<compile_context>
chip_gen: v7x
topology: tpu7x:2x2x1
jax: 0.10.0
libtpu: 0.0.40
codegen_flags: <defaults>
</compile_context>

<pallas_src>
import functools

import jax
import jax.numpy as jnp
from jax.experimental import pallas as pl
from jax.experimental.pallas import tpu as pltpu

LANE = 128


def _round_up(n, m):
    return ((n + m - 1) // m) * m


_vmem_limit_cache = None


def _vmem_limit_bytes():
    """Generation-aware VMEM limit (3/4 of physical, clamped to [32, 96] MiB)."""
    global _vmem_limit_cache
    if _vmem_limit_cache is None:
        cap = 64 * 1024 * 1024          # conservative fallback (v7x per-core)
        try:
            cap = int(pltpu.get_tpu_info().vmem_capacity_bytes)
        except Exception:
            pass
        _vmem_limit_cache = max(32 * 1024 * 1024,
                                min(cap * 3 // 4, 96 * 1024 * 1024))
    return _vmem_limit_cache


# ------------------------------ Pallas kernels ------------------------------

def _conv_bn_relu_body(xp_ref, wa_ref, wb_ref, bias_ref, *, m, wo, k2):
    """3x3/s2/p1 conv as TWO matmuls over 9*Cin real taps, + bias + ReLU (f32).

    xp_ref:   ((tr+1)*Wo, 6*Cin) bf16, packed channels = (row_phase, kw, ci).
    wa_ref:   (6*Cin, Coutp) bf16  -- taps kh in {0,1}, BN scale folded in.
    wb_ref:   (3*Cin, Coutp) bf16  -- taps kh == 2,     BN scale folded in.
    bias_ref: (1, Coutp) f32 folded BN bias.
    """
    # kh in {0,1}: this output row's own packed row-block, all 6*Cin channels.
    acc = jnp.dot(xp_ref[0:m, :], wa_ref[...],
                  preferred_element_type=jnp.float32)
    # kh == 2: next row-block (static +Wo row offset), row-phase 0 only
    # -> contiguous [0:3*Cin] lane slice.
    acc = acc + jnp.dot(xp_ref[wo:wo + m, 0:k2], wb_ref[...],
                        preferred_element_type=jnp.float32)
    return jnp.maximum(acc + bias_ref[...], 0.0)


def _conv3x3_bn_relu_kernel(xp_ref, wa_ref, wb_ref, bias_ref, o_ref,
                            *, m, wo, k2):
    y = _conv_bn_relu_body(xp_ref, wa_ref, wb_ref, bias_ref, m=m, wo=wo, k2=k2)
    o_ref[...] = y.astype(o_ref.dtype)


def _conv3x3_bn_relu_proj_kernel(xp_ref, wa_ref, wb_ref, bias_ref, pw_ref,
                                 pb_ref, o_ref, *, m, wo, k2):
    """Layer-3 conv+BN+ReLU fused with the final 1x1 projection (+bias)."""
    y = _conv_bn_relu_body(xp_ref, wa_ref, wb_ref, bias_ref, m=m, wo=wo, k2=k2)
    p = jnp.dot(y.astype(jnp.bfloat16), pw_ref[...],
                preferred_element_type=jnp.float32)
    o_ref[...] = (p + pb_ref[...]).astype(o_ref.dtype)


# ---------------------------- host-side packing ------------------------------

def _pack6(x_nhwc):
    """(B,H,W,C) -> (B, (Ho+1)*Wo, 6*C) bf16 column-im2col / row-phase packing.

    packed[b, rblk*Wo + j, (ph*3 + kw)*C + ci] = x_pad[b, 2*rblk + ph, 2*j + kw, ci]
    where x_pad is the input zero-padded by 1 on each spatial side.
    """
    B, H, W, C = x_nhwc.shape
    assert H % 2 == 0 and W % 2 == 0
    Ho, Wo = H // 2, W // 2
    xp = jnp.pad(x_nhwc, ((0, 0), (1, 1), (1, 1), (0, 0)))       # (B,H+2,W+2,C)
    xp = xp.reshape(B, Ho + 1, 2, W + 2, C)                      # row phase ph
    taps = [xp[:, :, :, k:k + 2 * Wo:2, :] for k in range(3)]    # kw = 0,1,2
    t = jnp.stack(taps, axis=4)                                  # (B,Ho+1,2,Wo,3,C)
    t = jnp.transpose(t, (0, 1, 3, 2, 4, 5))                     # (B,Ho+1,Wo,ph,kw,C)
    packed = t.reshape(B, (Ho + 1) * Wo, 6 * C)
    return packed.astype(jnp.bfloat16), Ho, Wo


def _pack_w3(w_oihw, bn_scale, coutp):
    """(Cout,Cin,3,3) + BN scale -> (6*Cin,Coutp) / (3*Cin,Coutp) bf16 weights."""
    cout, cin = w_oihw.shape[0], w_oihw.shape[1]
    wf = (w_oihw.astype(jnp.float32) *
          bn_scale.astype(jnp.float32)[:, None, None, None])      # fold BN scale
    w_hwio = jnp.transpose(wf, (2, 3, 1, 0))                      # (kh,kw,cin,cout)
    wa = w_hwio[0:2].reshape(6 * cin, cout)                       # kh in {0,1}
    wb = w_hwio[2].reshape(3 * cin, cout)                         # kh == 2
    wa_p = jnp.zeros((6 * cin, coutp), jnp.float32).at[:, :cout].set(wa)
    wb_p = jnp.zeros((3 * cin, coutp), jnp.float32).at[:, :cout].set(wb)
    return wa_p.astype(jnp.bfloat16), wb_p.astype(jnp.bfloat16)


def _pad_vec(v, n):
    out = jnp.zeros((1, n), jnp.float32)
    return out.at[0, :v.shape[0]].set(v.astype(jnp.float32))


def _pack_proj(proj_w, proj_b, cinp, embp):
    """1x1 proj (Embed,Cin,1,1) -> (Cinp, Embp) bf16 weight + (1,Embp) f32 bias."""
    embed, cin = proj_w.shape[0], proj_w.shape[1]
    w2 = jnp.transpose(proj_w.reshape(embed, cin).astype(jnp.float32), (1, 0))
    pw = jnp.zeros((cinp, embp), jnp.float32).at[:cin, :embed].set(w2)
    return pw.astype(jnp.bfloat16), _pad_vec(proj_b, embp)


def _pick_row_tiles(ho, wo, kf, coutp, out_ch, out_item):
    """Smallest row-tile count (a divisor of ho) whose per-tile blocks fit a
    VMEM budget; bounds double-buffered working sets (v7x) and gives the
    megacore an extra 'parallel' axis when the batch is small."""
    budget = _vmem_limit_bytes() // 8
    for r in range(1, ho + 1):
        if ho % r:
            continue
        tr = ho // r
        in_bytes = (tr + 1) * wo * kf * 2
        out_bytes = tr * wo * (out_ch * out_item + coutp * 4)
        if in_bytes + out_bytes <= budget or tr == 1:
            return r
    return ho


# ------------------------------ layer wrapper --------------------------------

def _run_conv_layer(x_nhwc, wa, wb, bias, proj=None):
    """Conv2d(3,3,s=2,p=1,bias=False)+BN+ReLU (optionally fused 1x1 proj+bias)."""
    B, H, W, C = x_nhwc.shape
    kf, coutp = wa.shape
    k2 = wb.shape[0]
    assert kf == 6 * C and k2 == 3 * C

    xp_full, Ho, Wo = _pack6(x_nhwc)

    if proj is None:
        out_ch, out_dtype, out_item = coutp, jnp.bfloat16, 2
    else:
        out_ch, out_dtype, out_item = proj[0].shape[1], jnp.float32, 4

    r_tiles = _pick_row_tiles(Ho, Wo, kf, coutp, out_ch, out_item)
    tr = Ho // r_tiles
    rows_t = (tr + 1) * Wo
    m = tr * Wo

    # Overlapping row-block windows (one-row-block halo duplicated host-side)
    # so per-tile kernel blocks never overlap and the grid stays 'parallel'.
    xp = jnp.stack(
        [xp_full[:, t * tr * Wo: t * tr * Wo + rows_t, :]
         for t in range(r_tiles)],
        axis=1)                                          # (B, R, rows_t, 6C)

    in_specs = [
        pl.BlockSpec((None, None, rows_t, kf), lambda b, t: (b, t, 0, 0)),
        # Grid-invariant operands (constant index maps) stay VMEM-resident.
        pl.BlockSpec((kf, coutp), lambda b, t: (0, 0)),
        pl.BlockSpec((k2, coutp), lambda b, t: (0, 0)),
        pl.BlockSpec((1, coutp), lambda b, t: (0, 0)),
    ]
    args = [xp, wa, wb, bias]
    if proj is None:
        kernel = functools.partial(_conv3x3_bn_relu_kernel, m=m, wo=Wo, k2=k2)
    else:
        pw, pb = proj
        in_specs += [
            pl.BlockSpec(pw.shape, lambda b, t: (0, 0)),
            pl.BlockSpec(pb.shape, lambda b, t: (0, 0)),
        ]
        args += [pw, pb]
        kernel = functools.partial(_conv3x3_bn_relu_proj_kernel,
                                   m=m, wo=Wo, k2=k2)

    out = pl.pallas_call(
        kernel,
        out_shape=jax.ShapeDtypeStruct((B, r_tiles, m, out_ch), out_dtype),
        grid=(B, r_tiles),
        in_specs=in_specs,
        out_specs=pl.BlockSpec((None, None, m, out_ch),
                               lambda b, t: (b, t, 0, 0)),
        compiler_params=pltpu.CompilerParams(
            dimension_semantics=("parallel", "parallel"),
            vmem_limit_bytes=_vmem_limit_bytes()),
    )(*args)
    return out.reshape(B, Ho * Wo, out_ch), Ho, Wo


# ------------------------------- full module ---------------------------------

def init_params(key, in_chans=3, embed_dim=32):
    """Deterministic synthetic parameters matching the module's shapes."""
    assert embed_dim % 8 == 0
    dims = [in_chans]
    d = embed_dim // 8
    for _ in range(4):
        dims.append(d)
        d *= 2
    params = {}
    keys = jax.random.split(key, 16)
    ki = 0
    eps = 1e-5
    for i in range(4):
        cin, cout = dims[i], dims[i + 1]
        fan_in = float(cin * 9)
        params[f"conv{i}_w"] = (
            jax.random.normal(keys[ki], (cout, cin, 3, 3), jnp.float32)
            / jnp.sqrt(fan_in))
        ki += 1
        gamma = 1.0 + 0.05 * jnp.arange(cout, dtype=jnp.float32)
        beta = 0.01 * jnp.arange(cout, dtype=jnp.float32)
        rmean = 0.02 * jax.random.normal(keys[ki], (cout,), jnp.float32); ki += 1
        rvar = 1.0 + 0.1 * jnp.abs(
            jax.random.normal(keys[ki], (cout,), jnp.float32)); ki += 1
        scale = gamma / jnp.sqrt(rvar + eps)
        params[f"bn{i}_scale"] = scale
        params[f"bn{i}_bias"] = beta - rmean * scale
    cin = dims[-1]
    params["proj_w"] = (jax.random.normal(keys[ki], (embed_dim, cin, 1, 1),
                                          jnp.float32) / jnp.sqrt(float(cin)))
    params["proj_b"] = 0.01 * jnp.arange(embed_dim, dtype=jnp.float32)
    return params


def vit_conv_stem_forward(x_nchw, params):
    """Pallas-backed forward: NCHW input -> (B, num_patches, embed_dim)."""
    embed_dim = params["proj_w"].shape[0]
    B = x_nchw.shape[0]
    x = jnp.transpose(x_nchw, (0, 2, 3, 1)).astype(jnp.bfloat16)   # NHWC bf16
    out = None
    for i in range(4):
        w = params[f"conv{i}_w"]
        cout = w.shape[0]
        coutp = _round_up(cout, LANE)
        wa, wb = _pack_w3(w, params[f"bn{i}_scale"], coutp)
        bias = _pad_vec(params[f"bn{i}_bias"], coutp)
        if i < 3:
            out, Ho, Wo = _run_conv_layer(x, wa, wb, bias)
            # Drop lane-pad channels (exact zeros) before the next layer's
            # packing so the padding never re-enters HBM reads or MXU K.
            x = out.reshape(B, Ho, Wo, coutp)[..., :cout]
        else:
            embp = _round_up(embed_dim, LANE)
            pw, pb = _pack_proj(params["proj_w"], params["proj_b"], coutp, embp)
            out, Ho, Wo = _run_conv_layer(x, wa, wb, bias, proj=(pw, pb))
    # NCHW flatten(2).transpose(1,2) == row-major NHWC (B, H*W, C); norm=Identity.
    return out[:, :, :embed_dim]


def reference_forward(x_nchw, params):
    """Pure-JAX (XLA conv, f32 HIGHEST) reference for correctness checking."""
    x = x_nchw
    for i in range(4):
        x = jax.lax.conv_general_dilated(
            x, params[f"conv{i}_w"], window_strides=(2, 2),
            padding=((1, 1), (1, 1)),
            dimension_numbers=("NCHW", "OIHW", "NCHW"),
            precision=jax.lax.Precision.HIGHEST)
        s = params[f"bn{i}_scale"].reshape(1, -1, 1, 1)
        b = params[f"bn{i}_bias"].reshape(1, -1, 1, 1)
        x = jnp.maximum(x * s + b, 0.0)
    x = jax.lax.conv_general_dilated(
        x, params["proj_w"], window_strides=(1, 1), padding="VALID",
        dimension_numbers=("NCHW", "OIHW", "NCHW"),
        precision=jax.lax.Precision.HIGHEST)
    x = x + params["proj_b"].reshape(1, -1, 1, 1)
    B, C, H, W = x.shape
    return jnp.transpose(x.reshape(B, C, H * W), (0, 2, 1))


if __name__ == "__main__":
    # Small shapes consistent with the module: patch_size fixed at 16, so
    # img_size=32 -> grid 2x2 -> num_patches=4; embed_dim=32 (divisible by 8).
    B, C, H, W = 2, 3, 32, 32
    embed_dim = 32

    key = jax.random.PRNGKey(0)
    kx, kp = jax.random.split(key)
    x = jax.random.normal(kx, (B, C, H, W), jnp.float32)
    params = init_params(kp, in_chans=C, embed_dim=embed_dim)

    out = jax.jit(vit_conv_stem_forward)(x, params)
    out = jax.block_until_ready(out)

    assert out.shape == (B, (H // 16) * (W // 16), embed_dim), out.shape

    ref = jax.block_until_ready(reference_forward(x, params))
    max_err = float(jnp.max(jnp.abs(out - ref)))
    assert jnp.allclose(out, ref, rtol=3e-2, atol=3e-2), max_err

    print("KERNEL_OK")
</pallas_src>

<mosaic_0001>
module attributes {stable_mosaic.version = 11 : i64} {
  func.func @_conv3x3_bn_relu_kernel(%arg0: i32, %arg1: i32, %arg2: memref<1x1x272x18xbf16, #tpu.memory_space<vmem>>, %arg3: memref<18x128xbf16, #tpu.memory_space<vmem>>, %arg4: memref<9x128xbf16, #tpu.memory_space<vmem>>, %arg5: memref<1x128xf32, #tpu.memory_space<vmem>>, %arg6: memref<1x1x256x128xbf16, #tpu.memory_space<vmem>>) attributes {dimension_semantics = [#tpu.dimension_semantics<parallel>, #tpu.dimension_semantics<parallel>], iteration_bounds = array<i64: 2, 1>, scalar_prefetch = 0 : i64, scratch_operands = 0 : i64, tpu.core_type = #tpu.core_type<tc>, window_params = [{transform_indices = @transform_0, window_bounds = array<i64: 1, 1, 272, 18>}, {pipeline_mode = #tpu.pipeline_mode<synchronous>, transform_indices = @transform_1, window_bounds = array<i64: 18, 128>}, {pipeline_mode = #tpu.pipeline_mode<synchronous>, transform_indices = @transform_2, window_bounds = array<i64: 9, 128>}, {pipeline_mode = #tpu.pipeline_mode<synchronous>, transform_indices = @transform_3, window_bounds = array<i64: 1, 128>}, {transform_indices = @transform_4, window_bounds = array<i64: 1, 1, 256, 128>}]} {
    %c0 = arith.constant 0 : index
    %c0_0 = arith.constant 0 : index
    %c0_1 = arith.constant 0 : index
    %c0_2 = arith.constant 0 : index
    %0 = vector.load %arg2[%c0, %c0_0, %c0_1, %c0_2] : memref<1x1x272x18xbf16, #tpu.memory_space<vmem>>, vector<1x1x256x18xbf16>
    %1 = vector.shape_cast %0 : vector<1x1x256x18xbf16> to vector<256x18xbf16>
    %c0_3 = arith.constant 0 : index
    %c0_4 = arith.constant 0 : index
    %2 = vector.load %arg3[%c0_3, %c0_4] : memref<18x128xbf16, #tpu.memory_space<vmem>>, vector<18x128xbf16>
    %cst = arith.constant dense<0.000000e+00> : vector<256x128xf32>
    %3 = tpu.matmul %1, %2, %cst {dimension_numbers = #tpu.dot_dimension_numbers<[1], [0], [0], [1], [0, 0, 1, 1], [], []>} : vector<256x18xbf16>, vector<18x128xbf16>, vector<256x128xf32> -> vector<256x128xf32>
    %c0_5 = arith.constant 0 : index
    %c0_6 = arith.constant 0 : index
    %c16 = arith.constant 16 : index
    %c0_7 = arith.constant 0 : index
    %4 = vector.load %arg2[%c0_5, %c0_6, %c16, %c0_7] : memref<1x1x272x18xbf16, #tpu.memory_space<vmem>>, vector<1x1x256x9xbf16>
    %5 = vector.shape_cast %4 : vector<1x1x256x9xbf16> to vector<256x9xbf16>
    %c0_8 = arith.constant 0 : index
    %c0_9 = arith.constant 0 : index
    %6 = vector.load %arg4[%c0_8, %c0_9] : memref<9x128xbf16, #tpu.memory_space<vmem>>, vector<9x128xbf16>
    %cst_10 = arith.constant dense<0.000000e+00> : vector<256x128xf32>
    %7 = tpu.matmul %5, %6, %cst_10 {dimension_numbers = #tpu.dot_dimension_numbers<[1], [0], [0], [1], [0, 0, 1, 1], [], []>} : vector<256x9xbf16>, vector<9x128xbf16>, vector<256x128xf32> -> vector<256x128xf32>
    %8 = arith.addf %3, %7 : vector<256x128xf32>
    %c0_11 = arith.constant 0 : index
    %c0_12 = arith.constant 0 : index
    %9 = vector.load %arg5[%c0_11, %c0_12] : memref<1x128xf32, #tpu.memory_space<vmem>>, vector<1x128xf32>
    %10 = vector.broadcast %9 : vector<1x128xf32> to vector<256x128xf32>
    %11 = arith.addf %8, %10 : vector<256x128xf32>
    %cst_13 = arith.constant 0.000000e+00 : f32
    %12 = vector.broadcast %cst_13 : f32 to vector<256x128xf32>
    %13 = arith.maximumf %11, %12 : vector<256x128xf32>
    %14 = arith.truncf %13 : vector<256x128xf32> to vector<256x128xbf16>
    %c0_14 = arith.constant 0 : index
    %c0_15 = arith.constant 0 : index
    %c0_16 = arith.constant 0 : index
    %c0_17 = arith.constant 0 : index
    %15 = vector.load %arg6[%c0_14, %c0_15, %c0_16, %c0_17] : memref<1x1x256x128xbf16, #tpu.memory_space<vmem>>, vector<1x1x256x128xbf16>
    %16 = vector.shape_cast %15 : vector<1x1x256x128xbf16> to vector<256x128xbf16>
    %17 = vector.shape_cast %14 : vector<256x128xbf16> to vector<1x1x256x128xbf16>
    tpu.vector_store %arg6[%c0_14, %c0_15, %c0_16, %c0_17], %17 {strides = array<i32>} : memref<1x1x256x128xbf16, #tpu.memory_space<vmem>>, vector<1x1x256x128xbf16>,
    return
  }
  func.func @transform_0(%arg0: i32, %arg1: i32) -> (i32, i32, i32, i32) {
    %c0_i32 = arith.constant 0 : i32
    %c0_i32_0 = arith.constant 0 : i32
    %c0_i32_1 = arith.constant 0 : i32
    return %arg0, %arg1, %c0_i32, %c0_i32_0 : i32, i32, i32, i32
  }
  func.func @transform_1(%arg0: i32, %arg1: i32) -> (i32, i32) {
    %c0_i32 = arith.constant 0 : i32
    %c0_i32_0 = arith.constant 0 : i32
    %c0_i32_1 = arith.constant 0 : i32
    return %c0_i32, %c0_i32_0 : i32, i32
  }
  func.func @transform_2(%arg0: i32, %arg1: i32) -> (i32, i32) {
    %c0_i32 = arith.constant 0 : i32
    %c0_i32_0 = arith.constant 0 : i32
    %c0_i32_1 = arith.constant 0 : i32
    return %c0_i32, %c0_i32_0 : i32, i32
  }
  func.func @transform_3(%arg0: i32, %arg1: i32) -> (i32, i32) {
    %c0_i32 = arith.constant 0 : i32
    %c0_i32_0 = arith.constant 0 : i32
    %c0_i32_1 = arith.constant 0 : i32
    return %c0_i32, %c0_i32_0 : i32, i32
  }
  func.func @transform_4(%arg0: i32, %arg1: i32) -> (i32, i32, i32, i32) {
    %c0_i32 = arith.constant 0 : i32
    %c0_i32_0 = arith.constant 0 : i32
    %c0_i32_1 = arith.constant 0 : i32
    return %arg0, %arg1, %c0_i32, %c0_i32_0 : i32, i32, i32, i32
  }
}

module attributes {stable_mosaic.version = 11 : i64} {
  func.func @_conv3x3_bn_relu_kernel(%arg0: i32, %arg1: i32, %arg2: memref<1x1x72x24xbf16, #tpu.memory_space<vmem>>, %arg3: memref<24x128xbf16, #tpu.memory_space<vmem>>, %arg4: memref<12x128xbf16, #tpu.memory_space<vmem>>, %arg5: memref<1x128xf32, #tpu.memory_space<vmem>>, %arg6: memref<1x1x64x128xbf16, #tpu.memory_space<vmem>>) attributes {dimension_semantics = [#tpu.dimension_semantics<parallel>, #tpu.dimension_semantics<parallel>], iteration_bounds = array<i64: 2, 1>, scalar_prefetch = 0 : i64, scratch_operands = 0 : i64, tpu.core_type = #tpu.core_type<tc>, window_params = [{transform_indices = @transform_0, window_bounds = array<i64: 1, 1, 72, 24>}, {pipeline_mode = #tpu.pipeline_mode<synchronous>, transform_indices = @transform_1, window_bounds = array<i64: 24, 128>}, {pipeline_mode = #tpu.pipeline_mode<synchronous>, transform_indices = @transform_2, window_bounds = array<i64: 12, 128>}, {pipeline_mode = #tpu.pipeline_mode<synchronous>, transform_indices = @transform_3, window_bounds = array<i64: 1, 128>}, {transform_indices = @transform_4, window_bounds = array<i64: 1, 1, 64, 128>}]} {
    %c0 = arith.constant 0 : index
    %c0_0 = arith.constant 0 : index
    %c0_1 = arith.constant 0 : index
    %c0_2 = arith.constant 0 : index
    %0 = vector.load %arg2[%c0, %c0_0, %c0_1, %c0_2] : memref<1x1x72x24xbf16, #tpu.memory_space<vmem>>, vector<1x1x64x24xbf16>
    %1 = vector.shape_cast %0 : vector<1x1x64x24xbf16> to vector<64x24xbf16>
    %c0_3 = arith.constant 0 : index
    %c0_4 = arith.constant 0 : index
    %2 = vector.load %arg3[%c0_3, %c0_4] : memref<24x128xbf16, #tpu.memory_space<vmem>>, vector<24x128xbf16>
    %cst = arith.constant dense<0.000000e+00> : vector<64x128xf32>
    %3 = tpu.matmul %1, %2, %cst {dimension_numbers = #tpu.dot_dimension_numbers<[1], [0], [0], [1], [0, 0, 1, 1], [], []>} : vector<64x24xbf16>, vector<24x128xbf16>, vector<64x128xf32> -> vector<64x128xf32>
    %c0_5 = arith.constant 0 : index
    %c0_6 = arith.constant 0 : index
    %c8 = arith.constant 8 : index
    %c0_7 = arith.constant 0 : index
    %4 = vector.load %arg2[%c0_5, %c0_6, %c8, %c0_7] : memref<1x1x72x24xbf16, #tpu.memory_space<vmem>>, vector<1x1x64x12xbf16>
    %5 = vector.shape_cast %4 : vector<1x1x64x12xbf16> to vector<64x12xbf16>
    %c0_8 = arith.constant 0 : index
    %c0_9 = arith.constant 0 : index
    %6 = vector.load %arg4[%c0_8, %c0_9] : memref<12x128xbf16, #tpu.memory_space<vmem>>, vector<12x128xbf16>
    %cst_10 = arith.constant dense<0.000000e+00> : vector<64x128xf32>
    %7 = tpu.matmul %5, %6, %cst_10 {dimension_numbers = #tpu.dot_dimension_numbers<[1], [0], [0], [1], [0, 0, 1, 1], [], []>} : vector<64x12xbf16>, vector<12x128xbf16>, vector<64x128xf32> -> vector<64x128xf32>
    %8 = arith.addf %3, %7 : vector<64x128xf32>
    %c0_11 = arith.constant 0 : index
    %c0_12 = arith.constant 0 : index
    %9 = vector.load %arg5[%c0_11, %c0_12] : memref<1x128xf32, #tpu.memory_space<vmem>>, vector<1x128xf32>
    %10 = vector.broadcast %9 : vector<1x128xf32> to vector<64x128xf32>
    %11 = arith.addf %8, %10 : vector<64x128xf32>
    %cst_13 = arith.constant 0.000000e+00 : f32
    %12 = vector.broadcast %cst_13 : f32 to vector<64x128xf32>
    %13 = arith.maximumf %11, %12 : vector<64x128xf32>
    %14 = arith.truncf %13 : vector<64x128xf32> to vector<64x128xbf16>
    %c0_14 = arith.constant 0 : index
    %c0_15 = arith.constant 0 : index
    %c0_16 = arith.constant 0 : index
    %c0_17 = arith.constant 0 : index
    %15 = vector.load %arg6[%c0_14, %c0_15, %c0_16, %c0_17] : memref<1x1x64x128xbf16, #tpu.memory_space<vmem>>, vector<1x1x64x128xbf16>
    %16 = vector.shape_cast %15 : vector<1x1x64x128xbf16> to vector<64x128xbf16>
    %17 = vector.shape_cast %14 : vector<64x128xbf16> to vector<1x1x64x128xbf16>
    tpu.vector_store %arg6[%c0_14, %c0_15, %c0_16, %c0_17], %17 {strides = array<i32>} : memref<1x1x64x128xbf16, #tpu.memory_space<vmem>>, vector<1x1x64x128xbf16>,
    return
  }
  func.func @transform_0(%arg0: i32, %arg1: i32) -> (i32, i32, i32, i32) {
    %c0_i32 = arith.constant 0 : i32
    %c0_i32_0 = arith.constant 0 : i32
    %c0_i32_1 = arith.constant 0 : i32
    return %arg0, %arg1, %c0_i32, %c0_i32_0 : i32, i32, i32, i32
  }
  func.func @transform_1(%arg0: i32, %arg1: i32) -> (i32, i32) {
    %c0_i32 = arith.constant 0 : i32
    %c0_i32_0 = arith.constant 0 : i32
    %c0_i32_1 = arith.constant 0 : i32
    return %c0_i32, %c0_i32_0 : i32, i32
  }
  func.func @transform_2(%arg0: i32, %arg1: i32) -> (i32, i32) {
    %c0_i32 = arith.constant 0 : i32
    %c0_i32_0 = arith.constant 0 : i32
    %c0_i32_1 = arith.constant 0 : i32
    return %c0_i32, %c0_i32_0 : i32, i32
  }
  func.func @transform_3(%arg0: i32, %arg1: i32) -> (i32, i32) {
    %c0_i32 = arith.constant 0 : i32
    %c0_i32_0 = arith.constant 0 : i32
    %c0_i32_1 = arith.constant 0 : i32
    return %c0_i32, %c0_i32_0 : i32, i32
  }
  func.func @transform_4(%arg0: i32, %arg1: i32) -> (i32, i32, i32, i32) {
    %c0_i32 = arith.constant 0 : i32
    %c0_i32_0 = arith.constant 0 : i32
    %c0_i32_1 = arith.constant 0 : i32
    return %arg0, %arg1, %c0_i32, %c0_i32_0 : i32, i32, i32, i32
  }
}

module attributes {stable_mosaic.version = 11 : i64} {
  func.func @_conv3x3_bn_relu_kernel(%arg0: i32, %arg1: i32, %arg2: memref<1x1x20x48xbf16, #tpu.memory_space<vmem>>, %arg3: memref<48x128xbf16, #tpu.memory_space<vmem>>, %arg4: memref<24x128xbf16, #tpu.memory_space<vmem>>, %arg5: memref<1x128xf32, #tpu.memory_space<vmem>>, %arg6: memref<1x1x16x128xbf16, #tpu.memory_space<vmem>>) attributes {dimension_semantics = [#tpu.dimension_semantics<parallel>, #tpu.dimension_semantics<parallel>], iteration_bounds = array<i64: 2, 1>, scalar_prefetch = 0 : i64, scratch_operands = 0 : i64, tpu.core_type = #tpu.core_type<tc>, window_params = [{transform_indices = @transform_0, window_bounds = array<i64: 1, 1, 20, 48>}, {pipeline_mode = #tpu.pipeline_mode<synchronous>, transform_indices = @transform_1, window_bounds = array<i64: 48, 128>}, {pipeline_mode = #tpu.pipeline_mode<synchronous>, transform_indices = @transform_2, window_bounds = array<i64: 24, 128>}, {pipeline_mode = #tpu.pipeline_mode<synchronous>, transform_indices = @transform_3, window_bounds = array<i64: 1, 128>}, {transform_indices = @transform_4, window_bounds = array<i64: 1, 1, 16, 128>}]} {
    %c0 = arith.constant 0 : index
    %c0_0 = arith.constant 0 : index
    %c0_1 = arith.constant 0 : index
    %c0_2 = arith.constant 0 : index
    %0 = vector.load %arg2[%c0, %c0_0, %c0_1, %c0_2] : memref<1x1x20x48xbf16, #tpu.memory_space<vmem>>, vector<1x1x16x48xbf16>
    %1 = vector.shape_cast %0 : vector<1x1x16x48xbf16> to vector<16x48xbf16>
    %c0_3 = arith.constant 0 : index
    %c0_4 = arith.constant 0 : index
    %2 = vector.load %arg3[%c0_3, %c0_4] : memref<48x128xbf16, #tpu.memory_space<vmem>>, vector<48x128xbf16>
    %cst = arith.constant dense<0.000000e+00> : vector<16x128xf32>
    %3 = tpu.matmul %1, %2, %cst {dimension_numbers = #tpu.dot_dimension_numbers<[1], [0], [0], [1], [0, 0, 1, 1], [], []>} : vector<16x48xbf16>, vector<48x128xbf16>, vector<16x128xf32> -> vector<16x128xf32>
    %c0_5 = arith.constant 0 : index
    %c0_6 = arith.constant 0 : index
    %c4 = arith.constant 4 : index
    %c0_7 = arith.constant 0 : index
    %4 = vector.load %arg2[%c0_5, %c0_6, %c4, %c0_7] : memref<1x1x20x48xbf16, #tpu.memory_space<vmem>>, vector<1x1x16x24xbf16>
    %5 = vector.shape_cast %4 : vector<1x1x16x24xbf16> to vector<16x24xbf16>
    %c0_8 = arith.constant 0 : index
    %c0_9 = arith.constant 0 : index
    %6 = vector.load %arg4[%c0_8, %c0_9] : memref<24x128xbf16, #tpu.memory_space<vmem>>, vector<24x128xbf16>
    %cst_10 = arith.constant dense<0.000000e+00> : vector<16x128xf32>
    %7 = tpu.matmul %5, %6, %cst_10 {dimension_numbers = #tpu.dot_dimension_numbers<[1], [0], [0], [1], [0, 0, 1, 1], [], []>} : vector<16x24xbf16>, vector<24x128xbf16>, vector<16x128xf32> -> vector<16x128xf32>
    %8 = arith.addf %3, %7 : vector<16x128xf32>
    %c0_11 = arith.constant 0 : index
    %c0_12 = arith.constant 0 : index
    %9 = vector.load %arg5[%c0_11, %c0_12] : memref<1x128xf32, #tpu.memory_space<vmem>>, vector<1x128xf32>
    %10 = vector.broadcast %9 : vector<1x128xf32> to vector<16x128xf32>
    %11 = arith.addf %8, %10 : vector<16x128xf32>
    %cst_13 = arith.constant 0.000000e+00 : f32
    %12 = vector.broadcast %cst_13 : f32 to vector<16x128xf32>
    %13 = arith.maximumf %11, %12 : vector<16x128xf32>
    %14 = arith.truncf %13 : vector<16x128xf32> to vector<16x128xbf16>
    %c0_14 = arith.constant 0 : index
    %c0_15 = arith.constant 0 : index
    %c0_16 = arith.constant 0 : index
    %c0_17 = arith.constant 0 : index
    %15 = vector.load %arg6[%c0_14, %c0_15, %c0_16, %c0_17] : memref<1x1x16x128xbf16, #tpu.memory_space<vmem>>, vector<1x1x16x128xbf16>
    %16 = vector.shape_cast %15 : vector<1x1x16x128xbf16> to vector<16x128xbf16>
    %17 = vector.shape_cast %14 : vector<16x128xbf16> to vector<1x1x16x128xbf16>
    tpu.vector_store %arg6[%c0_14, %c0_15, %c0_16, %c0_17], %17 {strides = array<i32>} : memref<1x1x16x128xbf16, #tpu.memory_space<vmem>>, vector<1x1x16x128xbf16>,
    return
  }
  func.func @transform_0(%arg0: i32, %arg1: i32) -> (i32, i32, i32, i32) {
    %c0_i32 = arith.constant 0 : i32
    %c0_i32_0 = arith.constant 0 : i32
    %c0_i32_1 = arith.constant 0 : i32
    return %arg0, %arg1, %c0_i32, %c0_i32_0 : i32, i32, i32, i32
  }
  func.func @transform_1(%arg0: i32, %arg1: i32) -> (i32, i32) {
    %c0_i32 = arith.constant 0 : i32
    %c0_i32_0 = arith.constant 0 : i32
    %c0_i32_1 = arith.constant 0 : i32
    return %c0_i32, %c0_i32_0 : i32, i32
  }
  func.func @transform_2(%arg0: i32, %arg1: i32) -> (i32, i32) {
    %c0_i32 = arith.constant 0 : i32
    %c0_i32_0 = arith.constant 0 : i32
    %c0_i32_1 = arith.constant 0 : i32
    return %c0_i32, %c0_i32_0 : i32, i32
  }
  func.func @transform_3(%arg0: i32, %arg1: i32) -> (i32, i32) {
    %c0_i32 = arith.constant 0 : i32
    %c0_i32_0 = arith.constant 0 : i32
    %c0_i32_1 = arith.constant 0 : i32
    return %c0_i32, %c0_i32_0 : i32, i32
  }
  func.func @transform_4(%arg0: i32, %arg1: i32) -> (i32, i32, i32, i32) {
    %c0_i32 = arith.constant 0 : i32
    %c0_i32_0 = arith.constant 0 : i32
    %c0_i32_1 = arith.constant 0 : i32
    return %arg0, %arg1, %c0_i32, %c0_i32_0 : i32, i32, i32, i32
  }
}

module attributes {stable_mosaic.version = 11 : i64} {
  func.func @_conv3x3_bn_relu_proj_kernel(%arg0: i32, %arg1: i32, %arg2: memref<1x1x6x96xbf16, #tpu.memory_space<vmem>>, %arg3: memref<96x128xbf16, #tpu.memory_space<vmem>>, %arg4: memref<48x128xbf16, #tpu.memory_space<vmem>>, %arg5: memref<1x128xf32, #tpu.memory_space<vmem>>, %arg6: memref<128x128xbf16, #tpu.memory_space<vmem>>, %arg7: memref<1x128xf32, #tpu.memory_space<vmem>>, %arg8: memref<1x1x4x128xf32, #tpu.memory_space<vmem>>) attributes {dimension_semantics = [#tpu.dimension_semantics<parallel>, #tpu.dimension_semantics<parallel>], iteration_bounds = array<i64: 2, 1>, scalar_prefetch = 0 : i64, scratch_operands = 0 : i64, tpu.core_type = #tpu.core_type<tc>, window_params = [{transform_indices = @transform_0, window_bounds = array<i64: 1, 1, 6, 96>}, {pipeline_mode = #tpu.pipeline_mode<synchronous>, transform_indices = @transform_1, window_bounds = array<i64: 96, 128>}, {pipeline_mode = #tpu.pipeline_mode<synchronous>, transform_indices = @transform_2, window_bounds = array<i64: 48, 128>}, {pipeline_mode = #tpu.pipeline_mode<synchronous>, transform_indices = @transform_3, window_bounds = array<i64: 1, 128>}, {pipeline_mode = #tpu.pipeline_mode<synchronous>, transform_indices = @transform_4, window_bounds = array<i64: 128, 128>}, {pipeline_mode = #tpu.pipeline_mode<synchronous>, transform_indices = @transform_5, window_bounds = array<i64: 1, 128>}, {transform_indices = @transform_6, window_bounds = array<i64: 1, 1, 4, 128>}]} {
    %c0 = arith.constant 0 : index
    %c0_0 = arith.constant 0 : index
    %c0_1 = arith.constant 0 : index
    %c0_2 = arith.constant 0 : index
    %0 = vector.load %arg2[%c0, %c0_0, %c0_1, %c0_2] : memref<1x1x6x96xbf16, #tpu.memory_space<vmem>>, vector<1x1x4x96xbf16>
    %1 = vector.shape_cast %0 : vector<1x1x4x96xbf16> to vector<4x96xbf16>
    %c0_3 = arith.constant 0 : index
    %c0_4 = arith.constant 0 : index
    %2 = vector.load %arg3[%c0_3, %c0_4] : memref<96x128xbf16, #tpu.memory_space<vmem>>, vector<96x128xbf16>
    %cst = arith.constant dense<0.000000e+00> : vector<4x128xf32>
    %3 = tpu.matmul %1, %2, %cst {dimension_numbers = #tpu.dot_dimension_numbers<[1], [0], [0], [1], [0, 0, 1, 1], [], []>} : vector<4x96xbf16>, vector<96x128xbf16>, vector<4x128xf32> -> vector<4x128xf32>
    %c0_5 = arith.constant 0 : index
    %c0_6 = arith.constant 0 : index
    %c2 = arith.constant 2 : index
    %c0_7 = arith.constant 0 : index
    %4 = vector.load %arg2[%c0_5, %c0_6, %c2, %c0_7] : memref<1x1x6x96xbf16, #tpu.memory_space<vmem>>, vector<1x1x4x48xbf16>
    %5 = vector.shape_cast %4 : vector<1x1x4x48xbf16> to vector<4x48xbf16>
    %c0_8 = arith.constant 0 : index
    %c0_9 = arith.constant 0 : index
    %6 = vector.load %arg4[%c0_8, %c0_9] : memref<48x128xbf16, #tpu.memory_space<vmem>>, vector<48x128xbf16>
    %cst_10 = arith.constant dense<0.000000e+00> : vector<4x128xf32>
    %7 = tpu.matmul %5, %6, %cst_10 {dimension_numbers = #tpu.dot_dimension_numbers<[1], [0], [0], [1], [0, 0, 1, 1], [], []>} : vector<4x48xbf16>, vector<48x128xbf16>, vector<4x128xf32> -> vector<4x128xf32>
    %8 = arith.addf %3, %7 : vector<4x128xf32>
    %c0_11 = arith.constant 0 : index
    %c0_12 = arith.constant 0 : index
    %9 = vector.load %arg5[%c0_11, %c0_12] : memref<1x128xf32, #tpu.memory_space<vmem>>, vector<1x128xf32>
    %10 = vector.broadcast %9 : vector<1x128xf32> to vector<4x128xf32>
    %11 = arith.addf %8, %10 : vector<4x128xf32>
    %cst_13 = arith.constant 0.000000e+00 : f32
    %12 = vector.broadcast %cst_13 : f32 to vector<4x128xf32>
    %13 = arith.maximumf %11, %12 : vector<4x128xf32>
    %14 = arith.truncf %13 : vector<4x128xf32> to vector<4x128xbf16>
    %c0_14 = arith.constant 0 : index
    %c0_15 = arith.constant 0 : index
    %15 = vector.load %arg6[%c0_14, %c0_15] : memref<128x128xbf16, #tpu.memory_space<vmem>>, vector<128x128xbf16>
    %cst_16 = arith.constant dense<0.000000e+00> : vector<4x128xf32>
    %16 = tpu.matmul %14, %15, %cst_16 {dimension_numbers = #tpu.dot_dimension_numbers<[1], [0], [0], [1], [0, 0, 1, 1], [], []>} : vector<4x128xbf16>, vector<128x128xbf16>, vector<4x128xf32> -> vector<4x128xf32>
    %c0_17 = arith.constant 0 : index
    %c0_18 = arith.constant 0 : index
    %17 = vector.load %arg7[%c0_17, %c0_18] : memref<1x128xf32, #tpu.memory_space<vmem>>, vector<1x128xf32>
    %18 = vector.broadcast %17 : vector<1x128xf32> to vector<4x128xf32>
    %19 = arith.addf %16, %18 : vector<4x128xf32>
    %c0_19 = arith.constant 0 : index
    %c0_20 = arith.constant 0 : index
    %c0_21 = arith.constant 0 : index
    %c0_22 = arith.constant 0 : index
    %20 = vector.load %arg8[%c0_19, %c0_20, %c0_21, %c0_22] : memref<1x1x4x128xf32, #tpu.memory_space<vmem>>, vector<1x1x4x128xf32>
    %21 = vector.shape_cast %20 : vector<1x1x4x128xf32> to vector<4x128xf32>
    %22 = vector.shape_cast %19 : vector<4x128xf32> to vector<1x1x4x128xf32>
    tpu.vector_store %arg8[%c0_19, %c0_20, %c0_21, %c0_22], %22 {strides = array<i32>} : memref<1x1x4x128xf32, #tpu.memory_space<vmem>>, vector<1x1x4x128xf32>,
    return
  }
  func.func @transform_0(%arg0: i32, %arg1: i32) -> (i32, i32, i32, i32) {
    %c0_i32 = arith.constant 0 : i32
    %c0_i32_0 = arith.constant 0 : i32
    %c0_i32_1 = arith.constant 0 : i32
    return %arg0, %arg1, %c0_i32, %c0_i32_0 : i32, i32, i32, i32
  }
  func.func @transform_1(%arg0: i32, %arg1: i32) -> (i32, i32) {
    %c0_i32 = arith.constant 0 : i32
    %c0_i32_0 = arith.constant 0 : i32
    %c0_i32_1 = arith.constant 0 : i32
    return %c0_i32, %c0_i32_0 : i32, i32
  }
  func.func @transform_2(%arg0: i32, %arg1: i32) -> (i32, i32) {
    %c0_i32 = arith.constant 0 : i32
    %c0_i32_0 = arith.constant 0 : i32
    %c0_i32_1 = arith.constant 0 : i32
    return %c0_i32, %c0_i32_0 : i32, i32
  }
  func.func @transform_3(%arg0: i32, %arg1: i32) -> (i32, i32) {
    %c0_i32 = arith.constant 0 : i32
    %c0_i32_0 = arith.constant 0 : i32
    %c0_i32_1 = arith.constant 0 : i32
    return %c0_i32, %c0_i32_0 : i32, i32
  }
  func.func @transform_4(%arg0: i32, %arg1: i32) -> (i32, i32) {
    %c0_i32 = arith.constant 0 : i32
    %c0_i32_0 = arith.constant 0 : i32
    %c0_i32_1 = arith.constant 0 : i32
    return %c0_i32, %c0_i32_0 : i32, i32
  }
  func.func @transform_5(%arg0: i32, %arg1: i32) -> (i32, i32) {
    %c0_i32 = arith.constant 0 : i32
    %c0_i32_0 = arith.constant 0 : i32
    %c0_i32_1 = arith.constant 0 : i32
    return %c0_i32, %c0_i32_0 : i32, i32
  }
  func.func @transform_6(%arg0: i32, %arg1: i32) -> (i32, i32, i32, i32) {
    %c0_i32 = arith.constant 0 : i32
    %c0_i32_0 = arith.constant 0 : i32
    %c0_i32_1 = arith.constant 0 : i32
    return %arg0, %arg1, %c0_i32, %c0_i32_0 : i32, i32, i32, i32
  }
}

</mosaic_0001>

<bundles_post_ra>
// kernel: vit_conv_stem_forward.4
= control target key start
LH: loop header
LB: loop body
LE: loop exit
PB: predicated region body
PF: predicated region fallthrough
CT: control target
= control target key end

     0   :  { %s1569_s15 = smov 0   ;;  %s1571_s16 = smov 0   ;;  %s1721_s0 = inlined_call_operand.vmem [shape: bf16[2,1,272,18], index: 0, kind: input, shape index: {}]   ;;  %s1722_s1 = inlined_call_operand.vmem [shape: bf16[18,128], index: 1, kind: input, shape index: {}]   ;;  %s1723_s2 = inlined_call_operand.vmem [shape: bf16[9,128], index: 2, kind: input, shape index: {}]   ;;  %s1724_s3 = inlined_call_operand.vmem [shape: f32[1,128], index: 3, kind: input, shape index: {}]   ;;  %s1725_s4 = inlined_call_operand.vmem [shape: bf16[2,1,256,128], index: 4, kind: output, shape index: {}]  }
   0x1   :  { %s1573_s17 = smov 0  }
   0x2 LB: > { %s26_s18 = sadd.s32 1, %s1537_s16  ;;  %p1116_p0 = scmp.ge.s32.totalorder %s1541_s17, 1  ;;  %s1541_s17 = sphi %s1573_s17, %s14_s17   ;;  %s1537_s16 = sphi %s1571_s16, %s1727_s16   ;;  %s1533_s15 = sphi %s1569_s15, %s1726_s15  }
   0x3   : > { %p28_p1 = scmp.ge.s32.totalorder %s26_s18, 2  ;;  %p182_p2 = scmp.lt.s32.totalorder %s1541_s17, 3 }
   0x5   : > { %s1729_s18 = smov (%p28_p1, %s26_s18), 0  ;;  %p183_p3 = pnand %p1116_p0, %p182_p2 }
   0x6   : > { %v1499_v0 = vld [vmem:[%s1722_s1] sm:$0xff] (!%p183_p3)   ;;  %vm408_vm0 = vcmask (!%p183_p3), 1043456   ;;  %vm409_vm1 = vcmask (!%p183_p3), 1044480   ;;  %vm624_vm2 = vcmask (!%p183_p3), 1040384   ;;  %p216_p4 = scmp.lt.s32.totalorder (!%p183_p3), %s1533_s15, 1  ;;  %v1543_v2 = vmov (!%p183_p3), 65535  }
   0x7   : > { %186 = sbr.rel (%p183_p3) target bundleno = 300 (0x12c), region = 36  ;;  %v1500_v1 = vld [vmem:[%s1723_s2] sm:$0x1f] (!%p183_p3)   ;;  %1404 = vmatprep.subr.bf16.mxu0 (!%p183_p3), %v1499_v0  ;;  %v410_v3 = vsel (!%p183_p3), %vm408_vm0, 4294967295, %v1543_v2  ;;  %vm359_vm3 = vcmask (!%p183_p3), 72704   ;;  %vm590_vm4 = vcmask (!%p183_p3), 146432  }
   0x8   : > { %1405 = vmatpush3.bf16.msra.mxu0 (!%p183_p3), %v1499_v0  ;;  %v1501_v4 = vld [vmem:[%s1722_s1 + $0x8] ss:$0 sps:$4 sm:$0x11] (!%p183_p3)   ;;  %v411_v5 = vsel (!%p183_p3), %vm409_vm1, %v410_v3, 0  ;;  %v1656_v27 = vld [vmem:[%s1724_s3] ss:$0 sm:$0xff] (!%p183_p3) }
   0x9   : > { %v413_v6 = vand.u32 (!%p183_p3), %v1500_v1, %v411_v5  ;;  %1472 = vmatprep.subr.msk.bf16.mxu0 (!%p183_p3), %vm624_vm2, %v1501_v4  ;;  %v626_v7 = vsel (!%p183_p3), %vm624_vm2, %v1501_v4, 0 }
   0xb   : > { %1370 = vmatprep.subr.bf16.mxu1 (!%p183_p3), %v413_v6 }
   0xc   : > { %1407 = vmatpush3.bf16.msra.mxu0 (!%p183_p3), %v626_v7  ;;  %1371 = vmatpush3.bf16.msra.mxu1 (!%p183_p3), %v413_v6 }
   0xe   : > { %s1731_s15 = smov (!%p216_p4, %s1533_s15), 1 }
   0xf   : > { %s1473_s25 = smul.u32 136, %s1731_s15  ;;  %s1207_s5 = sshll.u32 %s1731_s15, 7 }
  0x10   : > { %s1666_s8 = scalar_lea.vmem %s1725_s4, %s1207_s5 }
  0x11   : > { %s1602_s28 = scalar_lea.vmem %s1721_s0, %s1473_s25 }
  0x12   : > { %v1502_v8 = vld [vmem:[%s1602_s28 + $0x8] sm:$0xff]   ;;  %v1503_v9 = vld [vmem:[%s1602_s28] sm:$0xff]   ;;  %v1504_v10 = vld [vmem:[%s1602_s28 + $0x10] sm:$0xff]  }
  0x13   : > { %1372 = vmatprep.mubr.msk.bf16.mxu1 %vm359_vm3, %v1502_v8  ;;  %1408 = vmatprep.mubr.msk.bf16.mxu0 %vm590_vm4, %v1503_v9  ;;  %v1505_v11 = vld [vmem:[%s1602_s28 + $0x18] sm:$0xff]   ;;  %v1506_v12 = vld [vmem:[%s1602_s28 + $0x20] sm:$0xff]   ;;  %v1507_v13 = vld [vmem:[%s1602_s28 + $0x28] sm:$0xff]  }
  0x14   : > { %1373 = vmatmul.mubr.msk.bf16.vlgmr.msra.gmra.mrb[0].mxu1 %vm359_vm3, %v1504_v10  ;;  %1409 = vmatmul.mubr.msk.bf16.vlgmr.msra.gmra.mrb[0].mxu0 %vm590_vm4, %v1502_v8  ;;  %v1508_v14 = vld [vmem:[%s1602_s28 + $0x30] sm:$0xff]   ;;  %v1509_v15 = vld [vmem:[%s1602_s28 + $0x38] sm:$0xff]   ;;  %v1510_v16 = vld [vmem:[%s1602_s28 + $0x40] sm:$0xff]  }
  0x15   : > { %1376 = vmatprep.mubr.msk.bf16.mxu1 %vm359_vm3, %v1505_v11  ;;  %1412 = vmatprep.mubr.msk.bf16.mxu0 %vm590_vm4, %v1504_v10  ;;  %v1511_v17 = vld [vmem:[%s1602_s28 + $0x48] sm:$0xff]   ;;  %v1512_v18 = vld [vmem:[%s1602_s28 + $0x50] sm:$0xff]   ;;  %v1513_v19 = vld [vmem:[%s1602_s28 + $0x58] sm:$0xff]  }
  0x16   : > { %v1514_v20 = vld [vmem:[%s1602_s28 + $0x60] sm:$0xff]   ;;  %v1515_v21 = vld [vmem:[%s1602_s28 + $0x68] sm:$0xff]   ;;  %v1516_v22 = vld [vmem:[%s1602_s28 + $0x70] sm:$0xff]  }
  0x17   : > { %v1517_v23 = vld [vmem:[%s1602_s28 + $0x78] sm:$0xff]   ;;  %v1518_v24 = vld [vmem:[%s1602_s28 + $0x80] sm:$0xff]  }
  0x1c   : > { %1377 = vmatmul.mubr.msk.bf16.gmra.mrb[4].mxu1 %vm359_vm3, %v1506_v12  ;;  %1413 = vmatmul.mubr.msk.bf16.gmra.mrb[4].mxu0 %vm590_vm4, %v1505_v11 }
  0x1d   : > { %1380 = vmatprep.mubr.msk.bf16.mxu1 %vm359_vm3, %v1507_v13  ;;  %1416 = vmatprep.mubr.msk.bf16.mxu0 %vm590_vm4, %v1506_v12 }
  0x24   : > { %1381 = vmatmul.mubr.msk.bf16.gmra.mrb[8].mxu1 %vm359_vm3, %v1508_v14  ;;  %1417 = vmatmul.mubr.msk.bf16.gmra.mrb[8].mxu0 %vm590_vm4, %v1507_v13 }
  0x25   : > { %1384 = vmatprep.mubr.msk.bf16.mxu1 %vm359_vm3, %v1509_v15  ;;  %1420 = vmatprep.mubr.msk.bf16.mxu0 %vm590_vm4, %v1508_v14 }
  0x2c   : > { %1385 = vmatmul.mubr.msk.bf16.gmra.mrb[12].mxu1 %vm359_vm3, %v1510_v16  ;;  %1421 = vmatmul.mubr.msk.bf16.gmra.mrb[12].mxu0 %vm590_vm4, %v1509_v15 }
  0x2d   : > { %1388 = vmatprep.mubr.msk.bf16.mxu1 %vm359_vm3, %v1511_v17  ;;  %1424 = vmatprep.mubr.msk.bf16.mxu0 %vm590_vm4, %v1510_v16 }
  0x34   : > { %1389 = vmatmul.mubr.msk.bf16.gmra.mrb[16].mxu1 %vm359_vm3, %v1512_v18  ;;  %1425 = vmatmul.mubr.msk.bf16.gmra.mrb[16].mxu0 %vm590_vm4, %v1511_v17 }
  0x35   : > { %1392 = vmatprep.mubr.msk.bf16.mxu1 %vm359_vm3, %v1513_v19  ;;  %1428 = vmatprep.mubr.msk.bf16.mxu0 %vm590_vm4, %v1512_v18 }
  0x3c   : > { %1393 = vmatmul.mubr.msk.bf16.gmra.mrb[20].mxu1 %vm359_vm3, %v1514_v20  ;;  %1429 = vmatmul.mubr.msk.bf16.gmra.mrb[20].mxu0 %vm590_vm4, %v1513_v19 }
  0x3d   : > { %1396 = vmatprep.mubr.msk.bf16.mxu1 %vm359_vm3, %v1515_v21  ;;  %1432 = vmatprep.mubr.msk.bf16.mxu0 %vm590_vm4, %v1514_v20 }
  0x44   : > { %1397 = vmatmul.mubr.msk.bf16.gmra.mrb[24].mxu1 %vm359_vm3, %v1516_v22  ;;  %1433 = vmatmul.mubr.msk.bf16.gmra.mrb[24].mxu0 %vm590_vm4, %v1515_v21 }
  0x45   : > { %1400 = vmatprep.mubr.msk.bf16.mxu1 %vm359_vm3, %v1517_v23  ;;  %1436 = vmatprep.mubr.msk.bf16.mxu0 %vm590_vm4, %v1516_v22 }
  0x4c   : > { %1401 = vmatmul.mubr.msk.bf16.gmra.mrb[28].mxu1 %vm359_vm3, %v1518_v24  ;;  %1437 = vmatmul.mubr.msk.bf16.gmra.mrb[28].mxu0 %vm590_vm4, %v1517_v23 }
  0xe7   : > { %v1374_v25 = vpop.f32.mrb[0].mxu1  ;;  %v1410_v26 = vpop.f32.mrb[0].mxu0 }
  0xe8   : > { %v671_v28 = vadd.f32 %v1410_v26, %v1374_v25  ;;  %v449_v29 = vpop.f32.mrb[1].mxu1  ;;  %v662_v30 = vpop.f32.mrb[1].mxu0 }
  0xe9   : > { %v663_v31 = vadd.f32 %v662_v30, %v449_v29  ;;  %v1375_v32 = vpop.f32.mrb[2].mxu1  ;;  %v1411_v33 = vpop.f32.mrb[2].mxu0 }
  0xea   : > { %v798_v34 = vadd.f32 %v1656_v27, %v671_v28  ;;  %v674_v35 = vadd.f32 %v1411_v33, %v1375_v32  ;;  %v452_v36 = vpop.f32.mrb[3].mxu1  ;;  %v665_v37 = vpop.f32.mrb[3].mxu0 }
  0xeb   : > { %v796_v38 = vadd.f32 %v1656_v27, %v663_v31  ;;  %v666_v39 = vadd.f32 %v665_v37, %v452_v36 }
  0xec   : > { %v799_v40 = vadd.f32 %v1656_v27, %v674_v35  ;;  %v830_v42 = vmax.f32 %v798_v34, 0.0 }
  0xed   : > { %v797_v41 = vadd.f32 %v1656_v27, %v666_v39  ;;  %v828_v44 = vmax.f32 %v796_v38, 0.0 }
  0xee   : > { %v831_v43 = vmax.f32 %v799_v40, 0.0 }
  0xef   : > { %v829_v45 = vmax.f32 %v797_v41, 0.0  ;;  %v1378_v46 = vpop.f32.mrb[4].mxu1  ;;  %v1414_v47 = vpop.f32.mrb[4].mxu0 }
  0xf0   : > { %v1248_v48 = vpack.c.bf16 %v831_v43, %v830_v42  ;;  %v687_v49 = vadd.f32 %v1414_v47, %v1378_v46  ;;  %v465_v50 = vpop.f32.mrb[5].mxu1  ;;  %v678_v51 = vpop.f32.mrb[5].mxu0 }
  0xf1   : > { %v1243_v52 = vpack.c.bf16 %v829_v45, %v828_v44  ;;  %v679_v53 = vadd.f32 %v678_v51, %v465_v50  ;;  %v1379_v54 = vpop.f32.mrb[6].mxu1  ;;  %v1415_v55 = vpop.f32.mrb[6].mxu0 }
  0xf2   : > { %1320 = vst [vmem:[%s1666_s8 + $0x8] sm:$0xff] %v1248_v48   ;;  %v802_v56 = vadd.f32 %v1656_v27, %v687_v49  ;;  %v690_v57 = vadd.f32 %v1415_v55, %v1379_v54  ;;  %v468_v58 = vpop.f32.mrb[7].mxu1  ;;  %v681_v59 = vpop.f32.mrb[7].mxu0 }
  0xf3   : > { %1244 = vst [vmem:[%s1666_s8] sm:$0xff] %v1243_v52   ;;  %v800_v60 = vadd.f32 %v1656_v27, %v679_v53  ;;  %v682_v61 = vadd.f32 %v681_v59, %v468_v58 }
  0xf4   : > { %v803_v62 = vadd.f32 %v1656_v27, %v690_v57  ;;  %v834_v0 = vmax.f32 %v802_v56, 0.0 }
  0xf5   : > { %v801_v63 = vadd.f32 %v1656_v27, %v682_v61  ;;  %v832_v2 = vmax.f32 %v800_v60, 0.0 }
  0xf6   : > { %v835_v1 = vmax.f32 %v803_v62, 0.0 }
  0xf7   : > { %v833_v3 = vmax.f32 %v801_v63, 0.0  ;;  %v1382_v4 = vpop.f32.mrb[8].mxu1  ;;  %v1418_v5 = vpop.f32.mrb[8].mxu0 }
  0xf8   : > { %v1258_v6 = vpack.c.bf16 %v835_v1, %v834_v0  ;;  %v703_v7 = vadd.f32 %v1418_v5, %v1382_v4  ;;  %v481_v8 = vpop.f32.mrb[9].mxu1  ;;  %v694_v9 = vpop.f32.mrb[9].mxu0 }
  0xf9   : > { %v1253_v10 = vpack.c.bf16 %v833_v3, %v832_v2  ;;  %v695_v11 = vadd.f32 %v694_v9, %v481_v8  ;;  %v1383_v12 = vpop.f32.mrb[10].mxu1  ;;  %v1419_v13 = vpop.f32.mrb[10].mxu0 }
  0xfa   : > { %1322 = vst [vmem:[%s1666_s8 + $0x18] sm:$0xff] %v1258_v6   ;;  %v806_v14 = vadd.f32 %v1656_v27, %v703_v7  ;;  %v706_v15 = vadd.f32 %v1419_v13, %v1383_v12  ;;  %v484_v16 = vpop.f32.mrb[11].mxu1  ;;  %v697_v17 = vpop.f32.mrb[11].mxu0 }
  0xfb   : > { %1321 = vst [vmem:[%s1666_s8 + $0x10] sm:$0xff] %v1253_v10   ;;  %v804_v18 = vadd.f32 %v1656_v27, %v695_v11  ;;  %v698_v19 = vadd.f32 %v697_v17, %v484_v16 }
  0xfc   : > { %v807_v20 = vadd.f32 %v1656_v27, %v706_v15  ;;  %v838_v22 = vmax.f32 %v806_v14, 0.0 }
  0xfd   : > { %v805_v21 = vadd.f32 %v1656_v27, %v698_v19  ;;  %v836_v24 = vmax.f32 %v804_v18, 0.0 }
  0xfe   : > { %v839_v23 = vmax.f32 %v807_v20, 0.0 }
  0xff   : > { %v837_v25 = vmax.f32 %v805_v21, 0.0  ;;  %v1386_v26 = vpop.f32.mrb[12].mxu1  ;;  %v1422_v28 = vpop.f32.mrb[12].mxu0 }
 0x100   : > { %v1268_v29 = vpack.c.bf16 %v839_v23, %v838_v22  ;;  %v719_v30 = vadd.f32 %v1422_v28, %v1386_v26  ;;  %v497_v31 = vpop.f32.mrb[13].mxu1  ;;  %v710_v32 = vpop.f32.mrb[13].mxu0 }
 0x101   : > { %v1263_v33 = vpack.c.bf16 %v837_v25, %v836_v24  ;;  %v711_v34 = vadd.f32 %v710_v32, %v497_v31  ;;  %v1387_v35 = vpop.f32.mrb[14].mxu1  ;;  %v1423_v36 = vpop.f32.mrb[14].mxu0 }
 0x102   : > { %1324 = vst [vmem:[%s1666_s8 + $0x28] sm:$0xff] %v1268_v29   ;;  %v810_v37 = vadd.f32 %v1656_v27, %v719_v30  ;;  %v722_v38 = vadd.f32 %v1423_v36, %v1387_v35  ;;  %v500_v39 = vpop.f32.mrb[15].mxu1  ;;  %v713_v40 = vpop.f32.mrb[15].mxu0 }
 0x103   : > { %1323 = vst [vmem:[%s1666_s8 + $0x20] sm:$0xff] %v1263_v33   ;;  %v808_v41 = vadd.f32 %v1656_v27, %v711_v34  ;;  %v714_v42 = vadd.f32 %v713_v40, %v500_v39 }
 0x104   : > { %v811_v43 = vadd.f32 %v1656_v27, %v722_v38  ;;  %v842_v45 = vmax.f32 %v810_v37, 0.0 }
 0x105   : > { %v809_v44 = vadd.f32 %v1656_v27, %v714_v42  ;;  %v840_v47 = vmax.f32 %v808_v41, 0.0 }
 0x106   : > { %v843_v46 = vmax.f32 %v811_v43, 0.0 }
 0x107   : > { %v841_v48 = vmax.f32 %v809_v44, 0.0  ;;  %v1390_v49 = vpop.f32.mrb[16].mxu1  ;;  %v1426_v50 = vpop.f32.mrb[16].mxu0 }
 0x108   : > { %v1278_v51 = vpack.c.bf16 %v843_v46, %v842_v45  ;;  %v735_v52 = vadd.f32 %v1426_v50, %v1390_v49  ;;  %v513_v53 = vpop.f32.mrb[17].mxu1  ;;  %v726_v54 = vpop.f32.mrb[17].mxu0 }
 0x109   : > { %v1273_v55 = vpack.c.bf16 %v841_v48, %v840_v47  ;;  %v727_v56 = vadd.f32 %v726_v54, %v513_v53  ;;  %v1391_v57 = vpop.f32.mrb[18].mxu1  ;;  %v1427_v58 = vpop.f32.mrb[18].mxu0 }
 0x10a   : > { %1326 = vst [vmem:[%s1666_s8 + $0x38] sm:$0xff] %v1278_v51   ;;  %v814_v59 = vadd.f32 %v1656_v27, %v735_v52  ;;  %v738_v60 = vadd.f32 %v1427_v58, %v1391_v57  ;;  %v516_v61 = vpop.f32.mrb[19].mxu1  ;;  %v729_v62 = vpop.f32.mrb[19].mxu0 }
 0x10b   : > { %1325 = vst [vmem:[%s1666_s8 + $0x30] sm:$0xff] %v1273_v55   ;;  %v812_v63 = vadd.f32 %v1656_v27, %v727_v56  ;;  %v730_v0 = vadd.f32 %v729_v62, %v516_v61 }
 0x10c   : > { %v815_v1 = vadd.f32 %v1656_v27, %v738_v60  ;;  %v846_v3 = vmax.f32 %v814_v59, 0.0 }
 0x10d   : > { %v813_v2 = vadd.f32 %v1656_v27, %v730_v0  ;;  %v844_v5 = vmax.f32 %v812_v63, 0.0 }
 0x10e   : > { %v847_v4 = vmax.f32 %v815_v1, 0.0 }
 0x10f   : > { %v845_v6 = vmax.f32 %v813_v2, 0.0  ;;  %v1394_v7 = vpop.f32.mrb[20].mxu1  ;;  %v1430_v8 = vpop.f32.mrb[20].mxu0 }
 0x110   : > { %v1288_v9 = vpack.c.bf16 %v847_v4, %v846_v3  ;;  %v751_v10 = vadd.f32 %v1430_v8, %v1394_v7  ;;  %v529_v11 = vpop.f32.mrb[21].mxu1  ;;  %v742_v12 = vpop.f32.mrb[21].mxu0 }
 0x111   : > { %v1283_v13 = vpack.c.bf16 %v845_v6, %v844_v5  ;;  %v743_v14 = vadd.f32 %v742_v12, %v529_v11  ;;  %v1395_v15 = vpop.f32.mrb[22].mxu1  ;;  %v1431_v16 = vpop.f32.mrb[22].mxu0 }
 0x112   : > { %1328 = vst [vmem:[%s1666_s8 + $0x48] sm:$0xff] %v1288_v9   ;;  %v818_v17 = vadd.f32 %v1656_v27, %v751_v10  ;;  %v754_v18 = vadd.f32 %v1431_v16, %v1395_v15  ;;  %v532_v19 = vpop.f32.mrb[23].mxu1  ;;  %v745_v20 = vpop.f32.mrb[23].mxu0 }
 0x113   : > { %1327 = vst [vmem:[%s1666_s8 + $0x40] sm:$0xff] %v1283_v13   ;;  %v816_v21 = vadd.f32 %v1656_v27, %v743_v14  ;;  %v746_v22 = vadd.f32 %v745_v20, %v532_v19 }
 0x114   : > { %v819_v23 = vadd.f32 %v1656_v27, %v754_v18  ;;  %v850_v25 = vmax.f32 %v818_v17, 0.0 }
 0x115   : > { %v817_v24 = vadd.f32 %v1656_v27, %v746_v22  ;;  %v848_v28 = vmax.f32 %v816_v21, 0.0 }
 0x116   : > { %v851_v26 = vmax.f32 %v819_v23, 0.0 }
 0x117   : > { %v849_v29 = vmax.f32 %v817_v24, 0.0  ;;  %v1398_v30 = vpop.f32.mrb[24].mxu1  ;;  %v1434_v31 = vpop.f32.mrb[24].mxu0 }
 0x118   : > { %v1298_v32 = vpack.c.bf16 %v851_v26, %v850_v25  ;;  %v767_v33 = vadd.f32 %v1434_v31, %v1398_v30  ;;  %v545_v34 = vpop.f32.mrb[25].mxu1  ;;  %v758_v35 = vpop.f32.mrb[25].mxu0 }
 0x119   : > { %v1293_v36 = vpack.c.bf16 %v849_v29, %v848_v28  ;;  %v759_v37 = vadd.f32 %v758_v35, %v545_v34  ;;  %v1399_v38 = vpop.f32.mrb[26].mxu1  ;;  %v1435_v39 = vpop.f32.mrb[26].mxu0 }
 0x11a   : > { %1330 = vst [vmem:[%s1666_s8 + $0x58] sm:$0xff] %v1298_v32   ;;  %v822_v40 = vadd.f32 %v1656_v27, %v767_v33  ;;  %v770_v41 = vadd.f32 %v1435_v39, %v1399_v38  ;;  %v548_v42 = vpop.f32.mrb[27].mxu1  ;;  %v761_v43 = vpop.f32.mrb[27].mxu0 }
 0x11b   : > { %1329 = vst [vmem:[%s1666_s8 + $0x50] sm:$0xff] %v1293_v36   ;;  %v820_v44 = vadd.f32 %v1656_v27, %v759_v37  ;;  %v762_v45 = vadd.f32 %v761_v43, %v548_v42 }
 0x11c   : > { %v823_v46 = vadd.f32 %v1656_v27, %v770_v41  ;;  %v854_v48 = vmax.f32 %v822_v40, 0.0 }
 0x11d   : > { %v821_v47 = vadd.f32 %v1656_v27, %v762_v45  ;;  %v852_v50 = vmax.f32 %v820_v44, 0.0 }
 0x11e   : > { %v855_v49 = vmax.f32 %v823_v46, 0.0 }
 0x11f   : > { %v853_v51 = vmax.f32 %v821_v47, 0.0  ;;  %v1402_v52 = vpop.f32.mrb[28].mxu1  ;;  %v1438_v53 = vpop.f32.mrb[28].mxu0 }
 0x120   : > { %v1308_v54 = vpack.c.bf16 %v855_v49, %v854_v48  ;;  %v783_v55 = vadd.f32 %v1438_v53, %v1402_v52  ;;  %v561_v56 = vpop.f32.mrb[29].mxu1  ;;  %v774_v57 = vpop.f32.mrb[29].mxu0 }
 0x121   : > { %v1303_v58 = vpack.c.bf16 %v853_v51, %v852_v50  ;;  %v775_v59 = vadd.f32 %v774_v57, %v561_v56  ;;  %v1403_v60 = vpop.f32.mrb[30].mxu1  ;;  %v1439_v61 = vpop.f32.mrb[30].mxu0 }
 0x122   : > { %1332 = vst [vmem:[%s1666_s8 + $0x68] sm:$0xff] %v1308_v54   ;;  %v826_v62 = vadd.f32 %v1656_v27, %v783_v55  ;;  %v786_v63 = vadd.f32 %v1439_v61, %v1403_v60  ;;  %v564_v0 = vpop.f32.mrb[31].mxu1  ;;  %v777_v1 = vpop.f32.mrb[31].mxu0 }
 0x123   : > { %1331 = vst [vmem:[%s1666_s8 + $0x60] sm:$0xff] %v1303_v58   ;;  %v824_v2 = vadd.f32 %v1656_v27, %v775_v59  ;;  %v778_v3 = vadd.f32 %v777_v1, %v564_v0 }
 0x124   : > { %v827_v4 = vadd.f32 %v1656_v27, %v786_v63  ;;  %v858_v6 = vmax.f32 %v826_v62, 0.0 }
 0x125   : > { %v825_v5 = vadd.f32 %v1656_v27, %v778_v3  ;;  %v856_v8 = vmax.f32 %v824_v2, 0.0 }
 0x126   : > { %v859_v7 = vmax.f32 %v827_v4, 0.0 }
 0x127   : > { %v857_v9 = vmax.f32 %v825_v5, 0.0 }
 0x128   : > { %v1318_v10 = vpack.c.bf16 %v859_v7, %v858_v6 }
 0x129   : > { %v1313_v11 = vpack.c.bf16 %v857_v9, %v856_v8 }
 0x12a   : > { %1334 = vst [vmem:[%s1666_s8 + $0x78] sm:$0xff] %v1318_v10  }
 0x12b   : > { %1333 = vst [vmem:[%s1666_s8 + $0x70] sm:$0xff] %v1313_v11  }
 0x12c PF: > { %s14_s17 = sadd.s32 1, %s1541_s17   ;;  %s1726_s15 = smov %s1537_s16 }
 0x12d   : > { %p11_p5 = scmp.ge.s32.totalorder %s14_s17, 4   ;;  %s1727_s16 = smov %s1729_s18 }
 0x12f   :  { %13 = sbr.rel (!%p11_p5) target bundleno = 2 (0x2), region = 66 }

// kernel: vit_conv_stem_forward.5
= control target key start
LH: loop header
LB: loop body
LE: loop exit
PB: predicated region body
PF: predicated region fallthrough
CT: control target
= control target key end

     0   :  { %s806_s15 = smov 0   ;;  %s808_s16 = smov 0   ;;  %s863_s0 = inlined_call_operand.vmem [shape: bf16[2,1,72,24], index: 0, kind: input, shape index: {}]   ;;  %s864_s1 = inlined_call_operand.vmem [shape: bf16[24,128], index: 1, kind: input, shape index: {}]   ;;  %s865_s2 = inlined_call_operand.vmem [shape: bf16[12,128], index: 2, kind: input, shape index: {}]   ;;  %s866_s3 = inlined_call_operand.vmem [shape: f32[1,128], index: 3, kind: input, shape index: {}]   ;;  %s867_s4 = inlined_call_operand.vmem [shape: bf16[2,1,64,128], index: 4, kind: output, shape index: {}]  }
   0x1   :  { %s810_s17 = smov 0  }
   0x2 LB: > { %s26_s18 = sadd.s32 1, %s775_s16  ;;  %p612_p0 = scmp.ge.s32.totalorder %s779_s17, 1  ;;  %s779_s17 = sphi %s810_s17, %s14_s17   ;;  %s775_s16 = sphi %s808_s16, %s869_s16   ;;  %s771_s15 = sphi %s806_s15, %s868_s15  }
   0x3   : > { %p28_p1 = scmp.ge.s32.totalorder %s26_s18, 2  ;;  %p182_p2 = scmp.lt.s32.totalorder %s779_s17, 3 }
   0x5   : > { %s871_s18 = smov (%p28_p1, %s26_s18), 0  ;;  %p183_p3 = pnand %p612_p0, %p182_p2 }
   0x6   : > { %v746_v0 = vld [vmem:[%s864_s1] sm:$0xff] (!%p183_p3)   ;;  %vm287_vm0 = vcmask (!%p183_p3), 1045504   ;;  %v748_v2 = vld [vmem:[%s864_s1 + $0x8] ss:$0 sps:$4 sm:$0xff] (!%p183_p3)   ;;  %vm384_vm1 = vcmask (!%p183_p3), 1043456   ;;  %p216_p4 = scmp.lt.s32.totalorder (!%p183_p3), %s771_s15, 1 }
   0x7   : > { %186 = sbr.rel (%p183_p3) target bundleno = 255 (0xff), region = 36  ;;  %v747_v1 = vld [vmem:[%s865_s2] sm:$0x3f] (!%p183_p3)   ;;  %699 = vmatprep.subr.bf16.mxu0 (!%p183_p3), %v746_v0  ;;  %v386_v4 = vsel (!%p183_p3), %vm384_vm1, %v748_v2, 0  ;;  %vm274_vm2 = vcmask (!%p183_p3), 97280   ;;  %vm371_vm3 = vcmask (!%p183_p3), 195584  }
   0x8   : > { %700 = vmatpush3.bf16.msra.mxu0 (!%p183_p3), %v746_v0  ;;  %719 = vmatprep.subr.msk.bf16.mxu1 (!%p183_p3), %vm287_vm0, %v747_v1  ;;  %v289_v3 = vsel (!%p183_p3), %vm287_vm0, %v747_v1, 0  ;;  %v635_v24 = vld [vmem:[%s866_s3] ss:$0 sm:$0xff] (!%p183_p3) }
   0x9   : > { %720 = vmatprep.subr.msk.bf16.mxu0 (!%p183_p3), %vm384_vm1, %v748_v2  ;;  %690 = vmatpush3.bf16.msra.mxu1 (!%p183_p3), %v289_v3 }
   0xc   : > { %702 = vmatpush3.bf16.msra.mxu0 (!%p183_p3), %v386_v4 }
   0xe   : > { %s873_s15 = smov (!%p216_p4, %s771_s15), 1 }
   0xf   : > { %s721_s25 = smul.u32 36, %s873_s15  ;;  %s646_s5 = sshll.u32 %s873_s15, 5 }
  0x10   : > { %s233_s8 = scalar_lea.vmem %s867_s4, %s646_s5 }
  0x11   : > { %s224_s28 = scalar_lea.vmem %s863_s0, %s721_s25 }
  0x12   : > { %v236_v5 = vld [vmem:[%s224_s28 + $0x4] sm:$0xf]  ;;  %v237_v6 = vld [vmem:[%s224_s28 + $0x8] sm:$0xf]  ;;  %v238_v7 = vld [vmem:[%s224_s28 + $0xc] sm:$0xf] }
  0x13   : > { %v239_v8 = vld [vmem:[%s224_s28 + $0x10] sm:$0xf]  ;;  %v616_v9 = vcombine.low %v236_v5, %v237_v6  ;;  %v626_v10 = vcombine.low %v237_v6, %v238_v7  ;;  %v235_v11 = vld [vmem:[%s224_s28] sm:$0xf]  ;;  %v240_v12 = vld [vmem:[%s224_s28 + $0x14] sm:$0xf] }
  0x14   : > { %v617_v13 = vcombine.low %v238_v7, %v239_v8  ;;  %v625_v14 = vcombine.low %v235_v11, %v236_v5  ;;  %v241_v15 = vld [vmem:[%s224_s28 + $0x18] sm:$0xf]  ;;  %v627_v16 = vcombine.low %v239_v8, %v240_v12  ;;  %v242_v18 = vld [vmem:[%s224_s28 + $0x1c] sm:$0xf]  ;;  %v246_v19 = vld [vmem:[%s224_s28 + $0x20] sm:$0xf] }
  0x15   : > { %691 = vmatprep.mubr.msk.bf16.mxu1 %vm274_vm2, %v616_v9  ;;  %v618_v17 = vcombine.low %v240_v12, %v241_v15  ;;  %v619_v20 = vcombine.low %v242_v18, %v246_v19  ;;  %v628_v21 = vcombine.low %v241_v15, %v242_v18 }
  0x16   : > { %703 = vmatprep.mubr.msk.bf16.mxu0 %vm371_vm3, %v625_v14  ;;  %692 = vmatmul.mubr.msk.bf16.vlgmr.msra.gmra.mrb[0].mxu1 %vm274_vm2, %v617_v13 }
  0x17   : > { %704 = vmatmul.mubr.msk.bf16.vlgmr.msra.gmra.mrb[0].mxu0 %vm371_vm3, %v626_v10  ;;  %695 = vmatprep.mubr.msk.bf16.mxu1 %vm274_vm2, %v618_v17 }
  0x18   : > { %707 = vmatprep.mubr.msk.bf16.mxu0 %vm371_vm3, %v627_v16 }
  0x1e   : > { %696 = vmatmul.mubr.msk.bf16.gmra.mrb[4].mxu1 %vm274_vm2, %v619_v20 }
  0x1f   : > { %708 = vmatmul.mubr.msk.bf16.gmra.mrb[4].mxu0 %vm371_vm3, %v628_v21 }
  0xe9   : > { %v693_v22 = vpop.f32.mrb[0].mxu1 }
  0xea   : > { %v705_v23 = vpop.f32.mrb[0].mxu0  ;;  %v325_v25 = vpop.f32.mrb[1].mxu1 }
  0xeb   : > { %v431_v26 = vadd.f32 %v705_v23, %v693_v22  ;;  %v422_v27 = vpop.f32.mrb[1].mxu0  ;;  %v694_v28 = vpop.f32.mrb[2].mxu1 }
  0xec   : > { %v423_v29 = vadd.f32 %v422_v27, %v325_v25  ;;  %v706_v30 = vpop.f32.mrb[2].mxu0  ;;  %v328_v31 = vpop.f32.mrb[3].mxu1 }
  0xed   : > { %v462_v32 = vadd.f32 %v635_v24, %v431_v26  ;;  %v434_v33 = vadd.f32 %v706_v30, %v694_v28  ;;  %v425_v34 = vpop.f32.mrb[3].mxu0 }
  0xee   : > { %v460_v35 = vadd.f32 %v635_v24, %v423_v29  ;;  %v426_v36 = vadd.f32 %v425_v34, %v328_v31 }
  0xef   : > { %v463_v37 = vadd.f32 %v635_v24, %v434_v33  ;;  %v470_v39 = vmax.f32 %v462_v32, 0.0 }
  0xf0   : > { %v461_v38 = vadd.f32 %v635_v24, %v426_v36  ;;  %v468_v42 = vmax.f32 %v460_v35, 0.0 }
  0xf1   : > { %v471_v40 = vmax.f32 %v463_v37, 0.0  ;;  %v697_v41 = vpop.f32.mrb[4].mxu1 }
  0xf2   : > { %v469_v43 = vmax.f32 %v461_v38, 0.0  ;;  %v709_v44 = vpop.f32.mrb[4].mxu0  ;;  %v341_v45 = vpop.f32.mrb[5].mxu1 }
  0xf3   : > { %v663_v46 = vpack.c.bf16 %v471_v40, %v470_v39  ;;  %v447_v47 = vadd.f32 %v709_v44, %v697_v41  ;;  %v438_v48 = vpop.f32.mrb[5].mxu0  ;;  %v698_v49 = vpop.f32.mrb[6].mxu1 }
  0xf4   : > { %v658_v50 = vpack.c.bf16 %v469_v43, %v468_v42  ;;  %v439_v51 = vadd.f32 %v438_v48, %v341_v45  ;;  %v710_v52 = vpop.f32.mrb[6].mxu0  ;;  %v344_v53 = vpop.f32.mrb[7].mxu1 }
  0xf5   : > { %675 = vst [vmem:[%s233_s8 + $0x8] sm:$0xff] %v663_v46   ;;  %v466_v54 = vadd.f32 %v635_v24, %v447_v47  ;;  %v450_v55 = vadd.f32 %v710_v52, %v698_v49  ;;  %v441_v56 = vpop.f32.mrb[7].mxu0 }
  0xf6   : > { %659 = vst [vmem:[%s233_s8] sm:$0xff] %v658_v50   ;;  %v464_v57 = vadd.f32 %v635_v24, %v439_v51  ;;  %v442_v58 = vadd.f32 %v441_v56, %v344_v53 }
  0xf7   : > { %v467_v59 = vadd.f32 %v635_v24, %v450_v55  ;;  %v474_v61 = vmax.f32 %v466_v54, 0.0 }
  0xf8   : > { %v465_v60 = vadd.f32 %v635_v24, %v442_v58  ;;  %v472_v63 = vmax.f32 %v464_v57, 0.0 }
  0xf9   : > { %v475_v62 = vmax.f32 %v467_v59, 0.0 }
  0xfa   : > { %v473_v0 = vmax.f32 %v465_v60, 0.0 }
  0xfb   : > { %v673_v1 = vpack.c.bf16 %v475_v62, %v474_v61 }
  0xfc   : > { %v668_v2 = vpack.c.bf16 %v473_v0, %v472_v63 }
  0xfd   : > { %677 = vst [vmem:[%s233_s8 + $0x18] sm:$0xff] %v673_v1  }
  0xfe   : > { %676 = vst [vmem:[%s233_s8 + $0x10] sm:$0xff] %v668_v2  }
  0xff PF: > { %s14_s17 = sadd.s32 1, %s779_s17   ;;  %s868_s15 = smov %s775_s16 }
 0x100   : > { %p11_p5 = scmp.ge.s32.totalorder %s14_s17, 4   ;;  %s869_s16 = smov %s871_s18 }
 0x102   :  { %13 = sbr.rel (!%p11_p5) target bundleno = 2 (0x2), region = 66 }

// kernel: vit_conv_stem_forward.6
= control target key start
LH: loop header
LB: loop body
LE: loop exit
PB: predicated region body
PF: predicated region fallthrough
CT: control target
= control target key end

     0   :  { %s639_s15 = smov 0   ;;  %s641_s16 = smov 0   ;;  %s694_s0 = inlined_call_operand.vmem [shape: bf16[2,1,20,48], index: 0, kind: input, shape index: {}]   ;;  %s695_s1 = inlined_call_operand.vmem [shape: bf16[48,128], index: 1, kind: input, shape index: {}]   ;;  %s696_s2 = inlined_call_operand.vmem [shape: bf16[24,128], index: 2, kind: input, shape index: {}]   ;;  %s697_s3 = inlined_call_operand.vmem [shape: f32[1,128], index: 3, kind: input, shape index: {}]   ;;  %s698_s4 = inlined_call_operand.vmem [shape: bf16[2,1,16,128], index: 4, kind: output, shape index: {}]  }
   0x1   :  { %s643_s17 = smov 0  }
   0x2 LB: > { %s26_s18 = sadd.s32 1, %s606_s16  ;;  %p501_p0 = scmp.ge.s32.totalorder %s610_s17, 1  ;;  %s610_s17 = sphi %s643_s17, %s14_s17   ;;  %s606_s16 = sphi %s641_s16, %s700_s16   ;;  %s602_s15 = sphi %s639_s15, %s699_s15  }
   0x3   : > { %p28_p1 = scmp.ge.s32.totalorder %s26_s18, 2  ;;  %p182_p2 = scmp.lt.s32.totalorder %s610_s17, 3 }
   0x5   : > { %s702_s18 = smov (%p28_p1, %s26_s18), 0  ;;  %p183_p3 = pnand %p501_p0, %p182_p2 }
   0x6   : > { %v580_v0 = vld [vmem:[%s695_s1] sm:$0xff] (!%p183_p3)   ;;  %v612_v1 = vmov (!%p183_p3), 0.0   ;;  %vm273_vm0 = vcmask (!%p183_p3), 1043456   ;;  %v582_v3 = vld [vmem:[%s695_s1 + $0x8] sm:$0xff] (!%p183_p3)   ;;  %vm613_vm1 = vmmov (!%p183_p3), 0   ;;  %p216_p4 = scmp.lt.s32.totalorder (!%p183_p3), %s602_s15, 1 }
   0x7   : > { %186 = sbr.rel (%p183_p3) target bundleno = 247 (0xf7), region = 36  ;;  %543 = vmatprep.subr.bf16.mxu1 (!%p183_p3), %v612_v1  ;;  %535 = vmatprep.subr.bf16.mxu0 (!%p183_p3), %v612_v1  ;;  %v581_v2 = vld [vmem:[%s696_s2] sm:$0xff] (!%p183_p3)   ;;  %v583_v4 = vld [vmem:[%s696_s2 + $0x8] ss:$0 sps:$4 sm:$0xff] (!%p183_p3)   ;;  %v584_v6 = vld [vmem:[%s695_s1 + $0x10] sm:$0xff] (!%p183_p3)   ;;  %vm339_vm2 = vcmask (!%p183_p3), 392192  }
   0x8   : > { %544 = vmatpush3.bf16.msra.mxu1 (!%p183_p3), %v580_v0  ;;  %536 = vmatpush3.bf16.msra.mxu0 (!%p183_p3), %v581_v2  ;;  %v275_v5 = vsel (!%p183_p3), %vm273_vm0, %v583_v4, 0  ;;  %vm256_vm3 = vcmask (!%p183_p3), 1045504   ;;  %vm269_vm4 = vcmask (!%p183_p3), 195584   ;;  %v515_v19 = vld [vmem:[%s697_s3] ss:$0 sm:$0xff] (!%p183_p3) }
   0x9   : > { %545 = vmatprep.subr.bf16.mxu1 (!%p183_p3), %v612_v1  ;;  %537 = vmatprep.subr.bf16.mxu0 (!%p183_p3), %v612_v1 }
   0xa   : > { %539 = vmatprep.mubr.msk.bf16.mxu0 (!%p183_p3), %vm613_vm1, %v612_v1  ;;  %549 = vmatprep.mubr.msk.bf16.mxu1 (!%p183_p3), %vm613_vm1, %v612_v1 }
   0xc   : > { %546 = vmatpush3.bf16.msra.mxu1 (!%p183_p3), %v582_v3  ;;  %538 = vmatpush3.bf16.msra.mxu0 (!%p183_p3), %v275_v5 }
   0xd   : > { %547 = vmatprep.subr.bf16.mxu1 (!%p183_p3), %v612_v1 }
   0xe   : > { %s704_s15 = smov (!%p216_p4, %s602_s15), 1 }
   0xf   : > { %s553_s29 = smul.u32 12, %s704_s15  ;;  %s520_s9 = sshll.u32 %s704_s15, 3 }
  0x10   : > { %548 = vmatpush3.bf16.msra.mxu1 %v584_v6  ;;  %s233_s12 = scalar_lea.vmem %s698_s4, %s520_s9 }
  0x11   : > { %s224_s6 = scalar_lea.vmem %s694_s0, %s553_s29 }
  0x12   : > { %v236_v7 = vld [vmem:[%s224_s6 + $0x4] sm:$0xf]  ;;  %v243_v8 = vld [vmem:[%s224_s6] sm:$0xc] }
  0x13   : > { %v505_v9 = vcombine.low %v243_v8, %v236_v7  ;;  %v586_v10 = vld [vmem:[%s224_s6 + $0x8] ss:$0 sps:$4 sm:$0x33]   ;;  %v235_v11 = vld [vmem:[%s224_s6] sm:$0xf] }
  0x14   : > { %v510_v12 = vcombine.low %v235_v11, %v236_v7  ;;  %v258_v14 = vrot.slane %v586_v10, 2 }
  0x15   : > { %v257_v13 = vrot.slane %v505_v9, 2 }
  0x16   : > { %550 = vmatmul.mubr.msk.bf16.vlgmr.msra.gmra.mrb[0].mxu1 %vm339_vm2, %v510_v12 }
  0x17   : > { %v259_v15 = vsel %vm256_vm3, %v257_v13, %v258_v14 }
  0x18   : > { %540 = vmatmul.mubr.msk.bf16.vlgmr.msra.gmra.mrb[0].mxu0 %vm269_vm4, %v259_v15 }
  0xe9   : > { %v377_v16 = vpop.f32.mrb[0].mxu1 }
  0xea   : > { %v551_v17 = vpop.f32.mrb[1].mxu1 }
  0xeb   : > { %v311_v18 = vpop.f32.mrb[0].mxu0  ;;  %v380_v20 = vpop.f32.mrb[2].mxu1 }
  0xec   : > { %v541_v21 = vpop.f32.mrb[1].mxu0  ;;  %v378_v22 = vadd.f32 %v377_v16, %v311_v18  ;;  %v552_v23 = vpop.f32.mrb[3].mxu1 }
  0xed   : > { %v314_v24 = vpop.f32.mrb[2].mxu0 }
  0xee   : > { %v391_v25 = vadd.f32 %v515_v19, %v378_v22  ;;  %v542_v26 = vpop.f32.mrb[3].mxu0  ;;  %v381_v27 = vadd.f32 %v380_v20, %v314_v24 }
  0xf0   : > { %v392_v28 = vadd.f32 %v515_v19, %v381_v27  ;;  %v393_v29 = vmax.f32 %v391_v25, 0.0 }
  0xf2   : > { %v394_v30 = vmax.f32 %v392_v28, 0.0 }
  0xf4   : > { %v526_v31 = vpack.c.bf16 %v394_v30, %v393_v29 }
  0xf6   : > { %527 = vst [vmem:[%s233_s12] sm:$0xff] %v526_v31  }
  0xf7 PF: > { %s14_s17 = sadd.s32 1, %s610_s17   ;;  %s699_s15 = smov %s606_s16 }
  0xf8   : > { %p11_p5 = scmp.ge.s32.totalorder %s14_s17, 4   ;;  %s700_s16 = smov %s702_s18 }
  0xfa   :  { %13 = sbr.rel (!%p11_p5) target bundleno = 2 (0x2), region = 66 }

// kernel: vit_conv_stem_forward.7
= control target key start
LH: loop header
LB: loop body
LE: loop exit
PB: predicated region body
PF: predicated region fallthrough
CT: control target
= control target key end

     0   :  { %11 = vsyncpa [#allocation3], 0  ;;  %s1111_s0 = inlined_call_operand.vmem [shape: bf16[2,1,6,96], index: 0, kind: input, shape index: {}]   ;;  %s1112_s1 = inlined_call_operand.vmem [shape: bf16[96,128], index: 1, kind: input, shape index: {}]   ;;  %s1113_s2 = inlined_call_operand.vmem [shape: bf16[48,128], index: 2, kind: input, shape index: {}]   ;;  %s1114_s3 = inlined_call_operand.vmem [shape: f32[1,128], index: 3, kind: input, shape index: {}]   ;;  %s1115_s4 = inlined_call_operand.vmem [shape: bf16[128,128], index: 4, kind: input, shape index: {}]   ;;  %s1116_s5 = inlined_call_operand.vmem [shape: f32[1,128], index: 5, kind: input, shape index: {}]   ;;  %s1117_s6 = inlined_call_operand.hbm [shape: f32[2,1,4,128], index: 6, kind: output, shape index: {}]  }
   0x1   :  { %13 = vsyncpa [#allocation3 + $0x1], 0  ;;  %s939_s21 = smov 0   ;;  %s941_s22 = smov 0  }
   0x2   :  { %s943_s23 = smov 0   ;;  %s945_s24 = smov 0  }
   0x3   :  { %s947_s25 = smov 0   ;;  %s949_s26 = smov 0  }
   0x4 LB: > { %s647_s27 = sadd.s32 4294967295, %s899_s26   ;;  %s648_s28 = sadd.s32 4294967294, %s899_s26   ;;  %s899_s26 = sphi %s949_s26, %s19_s26   ;;  %s895_s25 = sphi %s947_s25, %s1124_s25   ;;  %s891_s24 = sphi %s945_s24, %s1123_s24   ;;  %s887_s23 = sphi %s943_s23, %s1122_s23   ;;  %s883_s22 = sphi %s941_s22, %s1121_s22   ;;  %s879_s21 = sphi %s939_s21, %s1120_s21  }
   0x5   : > { %s31_s29 = sadd.s32 1, %s895_s25  ;;  %s173_s30 = sadd.s32 1, %s887_s23 }
   0x6   : > { %p33_p0 = scmp.ge.s32.totalorder %s31_s29, 2  ;;  %p183_p1 = scmp.ne.s32.totalorder %s887_s23, %s883_s22 }
   0x7   : > { %p184_p2 = scmp.eq.s32.totalorder %s647_s27, 1  ;;  %p189_p3 = scmp.ne.s32.totalorder %s883_s22, %s879_s21 }
   0x8   : > { %s1126_s29 = smov (%p33_p0, %s31_s29), 0  ;;  %p190_p5 = scmp.eq.s32.totalorder %s648_s28, 1 }
   0x9   : > { %p979_p4 = por %p184_p2, %p183_p1  ;;  %s168_s8 = ssub.s32 %s895_s25, %s1126_s29 }
   0xa   : > { %p651_p6 = scmp.ge.s32.totalorder %s899_s26, 1  ;;  %p171_p7 = scmp.eq.s32.totalorder %s168_s8, 0 }
   0xb   : > { %p986_p8 = por %p190_p5, %p189_p3  ;;  %p233_p9 = scmp.lt.s32.totalorder %s899_s26, 3 }
   0xc   : > { %s992_s10 = scalar_select %p171_p7, %s887_s23, %s173_s30  }
   0xd   : > { %p234_p10 = pnand %p651_p6, %p233_p9 }
   0xe   : > { %v803_v0 = vld [vmem:[%s1113_s2] sm:$0xff] (!%p234_p10)   ;;  %v901_v1 = vmov (!%p234_p10), 0.0   ;;  %v804_v2 = vld [vmem:[%s1113_s2 + $0x8] sm:$0xff] (!%p234_p10)   ;;  %vm902_vm0 = vmmov (!%p234_p10), 0   ;;  %p265_p11 = scmp.lt.s32.totalorder (!%p234_p10), %s891_s24, 1  ;;  %v805_v3 = vld [vmem:[%s1113_s2 + $0x10] sm:$0xff] (!%p234_p10)  }
   0xf   : > { %237 = sbr.rel (%p234_p10) target bundleno = 501 (0x1f5), region = 44  ;;  %700 = vmatprep.subr.bf16.mxu1 (!%p234_p10), %v901_v1  ;;  %726 = vmatprep.subr.bf16.mxu0 (!%p234_p10), %v901_v1  ;;  %vm315_vm1 = vcmask (!%p234_p10), 392192   ;;  %v807_v6 = vld [vmem:[%s1112_s1] sm:$0xff] (!%p234_p10)   ;;  %v808_v7 = vld [vmem:[%s1112_s1 + $0x8] sm:$0xff] (!%p234_p10)   ;;  %v809_v8 = vld [vmem:[%s1112_s1 + $0x10] sm:$0xff] (!%p234_p10)   ;;  %vm395_vm2 = vcmask (!%p234_p10), 785408  }
  0x10   : > { %701 = vmatpush3.bf16.msra.mxu1 (!%p234_p10), %v803_v0  ;;  %706 = vmatprep.mubr.msk.bf16.mxu1 (!%p234_p10), %vm902_vm0, %v901_v1  ;;  %v810_v9 = vld [vmem:[%s1112_s1 + $0x18] sm:$0xff] (!%p234_p10)   ;;  %v811_v10 = vld [vmem:[%s1112_s1 + $0x20] sm:$0xff] (!%p234_p10)   ;;  %v812_v11 = vld [vmem:[%s1112_s1 + $0x28] sm:$0xff] (!%p234_p10)   ;;  %s262_s11 = sand.u32 (!%p234_p10), 1, %s883_s22   ;;  %s677_s14 = sshll.u32 (!%p234_p10), %s891_s24, 6 }
  0x11   : > { %702 = vmatprep.subr.bf16.mxu1 (!%p234_p10), %v901_v1  ;;  %742 = vmatprep.mubr.msk.bf16.mxu0 (!%p234_p10), %vm902_vm0, %v901_v1  ;;  %v813_v13 = vld [vmem:[%s1115_s4] sm:$0xff] (!%p234_p10)   ;;  %v814_v14 = vld [vmem:[%s1115_s4 + $0x8] sm:$0xff] (!%p234_p10)   ;;  %v815_v15 = vld [vmem:[%s1115_s4 + $0x10] sm:$0xff] (!%p234_p10)   ;;  %s652_s12 = sshll.u32 (!%p234_p10), %s262_s11, 2  ;;  %s1064_s19 = scalar_lea.hbm (!%p234_p10), %s1117_s6, %s677_s14 }
  0x12   : > { %727 = vmatpush3.bf16.msra.mxu0 (!%p234_p10), %v813_v13  ;;  %v816_v16 = vld [vmem:[%s1115_s4 + $0x18] sm:$0xff] (!%p234_p10)   ;;  %v817_v17 = vld [vmem:[%s1115_s4 + $0x20] sm:$0xff] (!%p234_p10)   ;;  %v818_v18 = vld [vmem:[%s1115_s4 + $0x28] sm:$0xff] (!%p234_p10)   ;;  %s562_s20 = scalar_lea.sflag (!%p234_p10), [#allocation3], %s262_s11  ;;  %s903_s28 = smov (!%p234_p10), [#allocation2]  }
  0x13   : > { %728 = vmatprep.subr.bf16.mxu0 (!%p234_p10), %v901_v1  ;;  %v819_v19 = vld [vmem:[%s1115_s4 + $0x30] sm:$0xff] (!%p234_p10)   ;;  %v820_v20 = vld [vmem:[%s1115_s4 + $0x38] sm:$0xff] (!%p234_p10)   ;;  %v666_v26 = vld [vmem:[%s1114_s3] ss:$0 sm:$0xff] (!%p234_p10)  ;;  %s825_s30 = sshll.u32 (!%p234_p10), %s903_s28, 4  ;;  %s826_s30 = int_to_ptr.vmem [resolvable:$false] %s825_s30 }
  0x14   : > { %703 = vmatpush3.bf16.msra.mxu1 (!%p234_p10), %v804_v2  ;;  %v667_v34 = vld [vmem:[%s1116_s5] ss:$0 sm:$0xff] (!%p234_p10)  ;;  %s827_s8 = scalar_lea.vmem (!%p234_p10), %s826_s30, 128 }
  0x15   : > { %704 = vmatprep.subr.bf16.mxu1 (!%p234_p10), %v901_v1 }
  0x16   : > { %s266_s15 = scalar_select %p265_p11, %s891_s24, 1  ;;  %729 = vmatpush3.bf16.msra.mxu0 %v814_v14 }
  0x17   : > { %730 = vmatprep.subr.bf16.mxu0 %v901_v1 }
  0x18   : > { %s653_s18 = sshll.u32 %s266_s15, 2  ;;  %705 = vmatpush3.bf16.msra.mxu1 %v805_v3  ;;  %s264_s15 = scalar_lea.vmem [#allocation2], %s652_s12 }
  0x19   : > { %s271_s27 = scalar_lea.vmem %s1111_s0, %s653_s18  ;;  %710 = vmatprep.subr.bf16.mxu1 %v901_v1  ;;  %s576_s16 = sshll.u32 %s264_s15, 4  ;;  %s1066_s16 = int_to_ptr.vmem [resolvable:$true] %s576_s16 }
  0x1a   : > { %v806_v4 = vld [vmem:[%s271_s27] ss:$0 sps:$4 sm:$0x66]   ;;  %731 = vmatpush3.bf16.msra.mxu0 %v815_v15  ;;  %s821_s24 = scalar_lea.vmem %s1066_s16, 64  ;;  %p828_p1 = scmp.lt.s32.totalorder %s1066_s16, %s826_s30 }
  0x1b   : > { %v296_v5 = vrot.slane %v806_v4, 1  ;;  %v273_v12 = vld [vmem:[%s271_s27] sm:$0x3]  ;;  %732 = vmatprep.subr.bf16.mxu0 %v901_v1  ;;  %p822_p12 = scmp.ne.s32.totalorder %s1066_s16, %s821_s24  ;;  %p829_p2 = scmp.lt.s32.totalorder %s827_s8, %s821_s24 }
  0x1d   : > { %707 = vmatmul.mubr.msk.bf16.vlgmr.msra.gmra.mrb[0].mxu1 %vm315_vm1, %v296_v5  ;;  %p823_p13 = pnand %p822_p12, %p979_p4  ;;  %p830_p3 = por %p829_p2, %p828_p1 }
  0x1e   : > { %711 = vmatpush3.bf16.msra.mxu1 %v807_v6  ;;  %722 = vmatprep.mubr.msk.bf16.mxu1 %vm902_vm0, %v901_v1 }
  0x1f   : > { %712 = vmatprep.subr.bf16.mxu1 %v901_v1  ;;  %733 = vmatpush3.bf16.msra.mxu0 %v816_v16  ;;  %p824_p0 = pneg %p823_p13 }
  0x20   : > { %734 = vmatprep.subr.bf16.mxu0 %v901_v1 }
  0x21   : > { %p831_p5 = pnand %p830_p3, %p824_p0 }
  0x22   : > { %713 = vmatpush3.bf16.msra.mxu1 %v808_v7 }
  0x23   : > { %714 = vmatprep.subr.bf16.mxu1 %v901_v1  ;;  %735 = vmatpush3.bf16.msra.mxu0 %v817_v17 }
  0x24   : > { %736 = vmatprep.subr.bf16.mxu0 %v901_v1 }
  0x26   : > { %715 = vmatpush3.bf16.msra.mxu1 %v809_v8 }
  0x27   : > { %716 = vmatprep.subr.bf16.mxu1 %v901_v1  ;;  %737 = vmatpush3.bf16.msra.mxu0 %v818_v18 }
  0x28   : > { %738 = vmatprep.subr.bf16.mxu0 %v901_v1 }
  0x2a   : > { %717 = vmatpush3.bf16.msra.mxu1 %v810_v9 }
  0x2b   : > { %718 = vmatprep.subr.bf16.mxu1 %v901_v1  ;;  %739 = vmatpush3.bf16.msra.mxu0 %v819_v19 }
  0x2c   : > { %740 = vmatprep.subr.bf16.mxu0 %v901_v1 }
  0x2e   : > { %719 = vmatpush3.bf16.msra.mxu1 %v811_v10 }
  0x2f   : > { %720 = vmatprep.subr.bf16.mxu1 %v901_v1  ;;  %741 = vmatpush3.bf16.msra.mxu0 %v820_v20 }
  0x32   : > { %721 = vmatpush3.bf16.msra.mxu1 %v812_v11 }
  0x35   : > { %723 = vmatmul.mubr.msk.bf16.vlgmr.msra.gmra.mrb[4].mxu1 %vm395_vm2, %v273_v12 }
  0xf0   : > { %v353_v21 = vpop.f32.mrb[0].mxu1 }
  0xf1   : > { %v708_v22 = vpop.f32.mrb[1].mxu1 }
  0xf2   : > { %v356_v23 = vpop.f32.mrb[2].mxu1 }
  0xf3   : > { %v709_v24 = vpop.f32.mrb[3].mxu1 }
 0x108   : > { %v433_v25 = vpop.f32.mrb[4].mxu1 }
 0x109   : > { %v434_v27 = vadd.f32 %v433_v25, %v353_v21  ;;  %v724_v28 = vpop.f32.mrb[5].mxu1 }
 0x10a   : > { %v436_v29 = vpop.f32.mrb[6].mxu1 }
 0x10b   : > { %v446_v30 = vadd.f32 %v666_v26, %v434_v27  ;;  %v725_v31 = vpop.f32.mrb[7].mxu1 }
 0x10d   : > { %v447_v32 = vmax.f32 %v446_v30, 0.0 }
 0x10f   : > { %v448_v33 = vpack.c.bf16 %v447_v32, %v447_v32 }
 0x111   : > { %743 = vmatmul.mubr.bf16.vlgmr.msra.gmra.mrb[0].mxu0 %v448_v33 }
 0x1e4   : > { %v554_v35 = vpop.f32.mrb[0].mxu0 }
 0x1e5   : > { %v555_v36 = vadd.f32 %v667_v34, %v554_v35  ;;  %v744_v37 = vpop.f32.mrb[1].mxu0 }
 0x1e6   : > { %v557_v38 = vpop.f32.mrb[2].mxu0 }
 0x1e7   : > { %560 = vst [vmem:[%s264_s15] sm:$0xf] %v555_v36  ;;  %v745_v39 = vpop.f32.mrb[3].mxu0 }
 0x1e8   : > { %834 = shalt.err (!%p831_p5)
}
 0x1e9   : > { %s835_s11 = scalar_lea.hbm %s1064_s19, 64  ;;  %s839_s13 = scalar_lea.hbm %s1117_s6, 128 }
 0x1ea   : > { %p836_p6 = scmp.ne.s32.totalorder %s1064_s19, %s835_s11  ;;  %p840_p10 = scmp.lt.u32.totalorder %s1064_s19, %s1117_s6 }
 0x1eb   : > { %p841_p11 = scmp.lt.u32.totalorder %s839_s13, %s835_s11  ;;  %p843_p13 = scmp.lt.u32.totalorder %s835_s11, %s1064_s19 }
 0x1ec   : > { %p837_p7 = pnand %p836_p6, %p979_p4 }
 0x1ed   : > { %p842_p12 = por %p841_p11, %p840_p10 }
 0x1ee   : > { %p838_p9 = pneg %p837_p7 }
 0x1ef   : > { %p844_p0 = por %p843_p13, %p842_p12 }
 0x1f1   : > { %p845_p1 = pnand %p844_p0, %p838_p9 }
 0x1f3   : > { %848 = shalt.err (!%p845_p1)
}
 0x1f4   : > { %746 = dma.vmem_to_hbm [thread:$0]  (%p979_p4), %s1066_s16, 64, %s1064_s19, %s562_s20  }
 0x1f5 PF: > { %p752_p2 = scmp.ge.s32.totalorder %s899_s26, 2  ;;  %s588_s17 = sand.u32 1, %s879_s21  }
 0x1f6   : > { %s589_s18 = scalar_lea.sflag [#allocation3], %s588_s17 }
 0x1f7   : > { %p749_p3 = pnand %p752_p2, %p986_p8 }
 0x1f9   : > { %874 = dma.done.wait (!%p749_p3), %s589_s18, 64  }
 0x1fa   : > { %876 = vsyncadd (!%p749_p3), %s589_s18, 4294967232  ;;  %s19_s26 = sadd.s32 1, %s899_s26   ;;  %s1120_s21 = smov %s883_s22 }
 0x1fb   : > { %p16_p5 = scmp.ge.s32.totalorder %s19_s26, 4   ;;  %s1121_s22 = smov %s887_s23 }
 0x1fc   : > { %s1122_s23 = smov %s992_s10  ;;  %s1123_s24 = smov %s895_s25 }
 0x1fd   : > { %s1124_s25 = smov %s1126_s29  ;;  %18 = sbr.rel (!%p16_p5) target bundleno = 4 (0x4), region = 79 }
 0x204   :  { %594 = vsyncpa [#allocation3], 1 }
 0x205   :  { %596 = vsyncpa [#allocation3 + $0x1], 1 }

</bundles_post_ra>
